<compile_context>
chip_gen: v7x
topology: tpu7x:2x2x1
jax: 0.10.0
libtpu: 0.0.40
codegen_flags: <defaults>
</compile_context>

<pallas_src>
import math

import jax
import jax.numpy as jnp
from jax.experimental import pallas as pl
from jax.experimental.pallas import tpu as pltpu

VMEM_SPEC = pl.BlockSpec(memory_space=pltpu.MemorySpace.VMEM)
_MIB = 1024 * 1024


def _vmem_limit(n_f32_elems):
    need = 4 * int(n_f32_elems)
    return int(min(64 * _MIB, max(8 * _MIB, 2 * need)))


# ---------------------------------------------------------------------------
# Encoder: fused multi-layer GRU over the full sequence in ONE kernel.
# Per layer: hoisted batched gx GEMM, then a serial recurrence over time.
# Activations are kept flat as (T*B, H); step t occupies rows [t*B, (t+1)*B).
# ---------------------------------------------------------------------------
def make_encoder_kernel(num_layers, T, B):
    NW = 12  # wih_r/z/n, whh_r/z/n, bih_r/z/n, bhh_r/z/n

    def kernel(*refs):
        x_ref = refs[0]                               # (T*B, E)
        w_refs = refs[1:1 + NW * num_layers]
        out_ref = refs[1 + NW * num_layers]           # (T*B, H)  last-layer activations
        hT_ref = refs[2 + NW * num_layers]            # (L, B, H) final hidden per layer
        act_ref = refs[3 + NW * num_layers]           # (T*B, H)  ping-pong buffer
        h_ref = refs[4 + NW * num_layers]             # (B, H)
        gxr_ref = refs[5 + NW * num_layers]           # (T*B, H)
        gxz_ref = refs[6 + NW * num_layers]
        gxn_ref = refs[7 + NW * num_layers]

        H = hT_ref.shape[2]

        for l in range(num_layers):
            (wih_r, wih_z, wih_n, whh_r, whh_z, whh_n,
             bih_r, bih_z, bih_n, bhh_r, bhh_z, bhh_n) = w_refs[NW * l:NW * (l + 1)]

            # Ping-pong so that the last layer writes straight into out_ref.
            dst = out_ref if (num_layers - 1 - l) % 2 == 0 else act_ref
            if l == 0:
                src = x_ref
            else:
                src = out_ref if (num_layers - l) % 2 == 0 else act_ref

            # Hoisted input-to-hidden GEMMs over the whole sequence (big MXU ops).
            x_all = src[...]                                           # (T*B, Din)
            gxr_ref[...] = jnp.dot(x_all, wih_r[...],
                                   preferred_element_type=jnp.float32) + bih_r[...]
            gxz_ref[...] = jnp.dot(x_all, wih_z[...],
                                   preferred_element_type=jnp.float32) + bih_z[...]
            gxn_ref[...] = jnp.dot(x_all, wih_n[...],
                                   preferred_element_type=jnp.float32) + bih_n[...]
            h_ref[...] = jnp.zeros((B, H), jnp.float32)

            def step(t, carry):
                row = pl.ds(t * B, B)
                h = h_ref[...]
                gh_r = jnp.dot(h, whh_r[...],
                               preferred_element_type=jnp.float32) + bhh_r[...]
                gh_z = jnp.dot(h, whh_z[...],
                               preferred_element_type=jnp.float32) + bhh_z[...]
                gh_n = jnp.dot(h, whh_n[...],
                               preferred_element_type=jnp.float32) + bhh_n[...]
                r = jax.nn.sigmoid(gxr_ref[row, :] + gh_r)
                z = jax.nn.sigmoid(gxz_ref[row, :] + gh_z)
                n = jnp.tanh(gxn_ref[row, :] + r * gh_n)
                h_new = (1.0 - z) * n + z * h
                h_ref[...] = h_new
                dst[row, :] = h_new
                return carry

            jax.lax.fori_loop(0, T, step, 0)
            hT_ref[l] = h_ref[...]

    return kernel


def run_encoder(x_flat, enc_layers, T, B):
    TB, _ = x_flat.shape
    L = len(enc_layers)
    H = enc_layers[0][3].shape[0]                     # whh_r: (H, H)
    flat_w = [w for layer in enc_layers for w in layer]
    n_elems = (x_flat.size + sum(int(w.size) for w in flat_w)
               + 2 * TB * H + L * B * H               # outputs
               + TB * H + B * H + 3 * TB * H)         # scratch
    kernel = make_encoder_kernel(L, T, B)
    return pl.pallas_call(
        kernel,
        out_shape=(jax.ShapeDtypeStruct((TB, H), jnp.float32),
                   jax.ShapeDtypeStruct((L, B, H), jnp.float32)),
        in_specs=[VMEM_SPEC] * (1 + len(flat_w)),
        out_specs=(VMEM_SPEC, VMEM_SPEC),
        scratch_shapes=[pltpu.VMEM((TB, H), jnp.float32),
                        pltpu.VMEM((B, H), jnp.float32),
                        pltpu.VMEM((TB, H), jnp.float32),
                        pltpu.VMEM((TB, H), jnp.float32),
                        pltpu.VMEM((TB, H), jnp.float32)],
        compiler_params=pltpu.CompilerParams(vmem_limit_bytes=_vmem_limit(n_elems)),
    )(x_flat, *flat_w)


# ---------------------------------------------------------------------------
# Decoder: attention + multi-layer GRU in one kernel. Emits the top-layer hidden
# state per step; the (large) vocab projection is a separate gridded GEMM kernel.
# ---------------------------------------------------------------------------
def make_decoder_kernel(num_layers, T, B):
    NW0 = 15   # layer 0: wih_{r,z,n}_emb, wih_{r,z,n}_ctx, whh_{r,z,n}, bih_{r,z,n}, bhh_{r,z,n}
    NW = 12    # layers >=1
    n_w = NW0 + NW * (num_layers - 1)

    def kernel(*refs):
        tgt_ref = refs[0]                             # (T*B, E)    target embeddings
        enc_ref = refs[1]                             # (B, T_enc, H_enc)
        h0_ref = refs[2]                              # (L, B, H)
        w_refs = refs[3:3 + n_w]
        out_ref = refs[3 + n_w]                       # (T*B, H)    top hidden per step
        hT_ref = refs[4 + n_w]                        # (L, B, H)
        h_ref = refs[5 + n_w]                         # scratch (L, B, H)
        gxr_ref = refs[6 + n_w]                       # (T*B, H)
        gxz_ref = refs[7 + n_w]
        gxn_ref = refs[8 + n_w]

        L = num_layers

        (wih_r_e, wih_z_e, wih_n_e, wih_r_c, wih_z_c, wih_n_c,
         whh_r0, whh_z0, whh_n0, bih_r0, bih_z0, bih_n0,
         bhh_r0, bhh_z0, bhh_n0) = w_refs[:NW0]

        h_ref[...] = h0_ref[...]

        # Hoisted layer-0 embedding half of the input GEMM (no sequential dependence
        # under teacher forcing) — batched over the whole target sequence.
        tgt_all = tgt_ref[...]                                        # (T*B, E)
        gxr_ref[...] = jnp.dot(tgt_all, wih_r_e[...],
                               preferred_element_type=jnp.float32) + bih_r0[...]
        gxz_ref[...] = jnp.dot(tgt_all, wih_z_e[...],
                               preferred_element_type=jnp.float32) + bih_z0[...]
        gxn_ref[...] = jnp.dot(tgt_all, wih_n_e[...],
                               preferred_element_type=jnp.float32) + bih_n0[...]

        def step(t, carry):
            row = pl.ds(t * B, B)

            # ---- Luong dot attention on the MXU (previous top-layer hidden) ----
            enc = enc_ref[...]                                        # (B, T_enc, H_enc)
            q = h_ref[L - 1][:, None, :]                              # (B, 1, H)
            scores = jnp.einsum('bqh,bth->bqt', q, enc,
                                preferred_element_type=jnp.float32)   # (B, 1, T_enc)
            scores = scores - jnp.max(scores, axis=-1, keepdims=True)
            p = jnp.exp(scores)
            p = p * pl.reciprocal(jnp.sum(p, axis=-1, keepdims=True), approx=True)
            ctx = jnp.einsum('bqt,bth->bqh', p, enc,
                             preferred_element_type=jnp.float32)[:, 0, :]  # (B, H_enc)

            # ---- layer 0: input = [embedding ; context] (emb half precomputed) ----
            h_prev = h_ref[0]
            gx_r = gxr_ref[row, :] + jnp.dot(ctx, wih_r_c[...],
                                             preferred_element_type=jnp.float32)
            gx_z = gxz_ref[row, :] + jnp.dot(ctx, wih_z_c[...],
                                             preferred_element_type=jnp.float32)
            gx_n = gxn_ref[row, :] + jnp.dot(ctx, wih_n_c[...],
                                             preferred_element_type=jnp.float32)
            gh_r = jnp.dot(h_prev, whh_r0[...],
                           preferred_element_type=jnp.float32) + bhh_r0[...]
            gh_z = jnp.dot(h_prev, whh_z0[...],
                           preferred_element_type=jnp.float32) + bhh_z0[...]
            gh_n = jnp.dot(h_prev, whh_n0[...],
                           preferred_element_type=jnp.float32) + bhh_n0[...]
            r = jax.nn.sigmoid(gx_r + gh_r)
            z = jax.nn.sigmoid(gx_z + gh_z)
            n = jnp.tanh(gx_n + r * gh_n)
            h_new = (1.0 - z) * n + z * h_prev
            h_ref[0] = h_new
            x = h_new

            # ---- layers 1 .. L-1 ----
            for l in range(1, L):
                (wih_r, wih_z, wih_n, whh_r, whh_z, whh_n,
                 bih_r, bih_z, bih_n, bhh_r, bhh_z, bhh_n) = \
                    w_refs[NW0 + NW * (l - 1):NW0 + NW * l]
                h_prev = h_ref[l]
                gx_r = jnp.dot(x, wih_r[...],
                               preferred_element_type=jnp.float32) + bih_r[...]
                gx_z = jnp.dot(x, wih_z[...],
                               preferred_element_type=jnp.float32) + bih_z[...]
                gx_n = jnp.dot(x, wih_n[...],
                               preferred_element_type=jnp.float32) + bih_n[...]
                gh_r = jnp.dot(h_prev, whh_r[...],
                               preferred_element_type=jnp.float32) + bhh_r[...]
                gh_z = jnp.dot(h_prev, whh_z[...],
                               preferred_element_type=jnp.float32) + bhh_z[...]
                gh_n = jnp.dot(h_prev, whh_n[...],
                               preferred_element_type=jnp.float32) + bhh_n[...]
                r = jax.nn.sigmoid(gx_r + gh_r)
                z = jax.nn.sigmoid(gx_z + gh_z)
                n = jnp.tanh(gx_n + r * gh_n)
                h_new = (1.0 - z) * n + z * h_prev
                h_ref[l] = h_new
                x = h_new

            out_ref[row, :] = x
            return carry

        jax.lax.fori_loop(0, T, step, 0)
        hT_ref[...] = h_ref[...]

    return kernel


def run_decoder(tgt_flat, enc_out_bm, h0, dec_layers, T, B):
    TB, _ = tgt_flat.shape
    L, _, H = h0.shape
    flat_w = [w for layer in dec_layers for w in layer]
    n_elems = (tgt_flat.size + enc_out_bm.size + h0.size
               + sum(int(w.size) for w in flat_w)
               + TB * H + L * B * H                   # outputs
               + L * B * H + 3 * TB * H)              # scratch
    kernel = make_decoder_kernel(L, T, B)
    return pl.pallas_call(
        kernel,
        out_shape=(jax.ShapeDtypeStruct((TB, H), jnp.float32),
                   jax.ShapeDtypeStruct((L, B, H), jnp.float32)),
        in_specs=[VMEM_SPEC] * (3 + len(flat_w)),
        out_specs=(VMEM_SPEC, VMEM_SPEC),
        scratch_shapes=[pltpu.VMEM((L, B, H), jnp.float32),
                        pltpu.VMEM((TB, H), jnp.float32),
                        pltpu.VMEM((TB, H), jnp.float32),
                        pltpu.VMEM((TB, H), jnp.float32)],
        compiler_params=pltpu.CompilerParams(vmem_limit_bytes=_vmem_limit(n_elems)),
    )(tgt_flat, enc_out_bm, h0, *flat_w)


# ---------------------------------------------------------------------------
# Vocab projection: one big (B*T, H) @ (H, V) GEMM, gridded ("parallel") over V.
# ---------------------------------------------------------------------------
def _proj_kernel(h_ref, w_ref, b_ref, o_ref):
    o_ref[...] = jnp.dot(h_ref[...], w_ref[...],
                         preferred_element_type=jnp.float32) + b_ref[...]


def run_projection(h_all, w_out, b_out):
    M, H = h_all.shape
    V = w_out.shape[1]
    if V % 128 == 0:
        tv = 128
        for cand in (2048, 1024, 512, 256, 128):
            if V % cand == 0:
                tv = cand
                break
    else:
        tv = V                                        # full-dim block (toy vocab)
    grid = (V // tv,)
    n_elems = M * H + 2 * (H * tv + tv + M * tv)
    return pl.pallas_call(
        _proj_kernel,
        out_shape=jax.ShapeDtypeStruct((M, V), jnp.float32),
        grid=grid,
        in_specs=[pl.BlockSpec((M, H), lambda j: (0, 0)),
                  pl.BlockSpec((H, tv), lambda j: (0, j)),
                  pl.BlockSpec((1, tv), lambda j: (0, j))],
        out_specs=pl.BlockSpec((M, tv), lambda j: (0, j)),
        compiler_params=pltpu.CompilerParams(
            dimension_semantics=("parallel",),
            vmem_limit_bytes=_vmem_limit(n_elems)),
    )(h_all, w_out, b_out)


# ---------------------------------------------------------------------------
# Parameter init (PyTorch-like uniform(-1/sqrt(H), 1/sqrt(H)), gate-split layout)
# ---------------------------------------------------------------------------
def _uniform(key, shape, bound):
    return jax.random.uniform(key, shape, jnp.float32, -bound, bound)


def init_params(key, enc_vocab, enc_emb_dim, enc_hidden, enc_layers,
                dec_vocab, dec_emb_dim, dec_layers, dec_hidden):
    keys = iter(jax.random.split(key, 512))
    p = {}
    p["enc_emb"] = jax.random.normal(next(keys), (enc_vocab, enc_emb_dim),
                                     jnp.float32) * 0.1
    p["dec_emb"] = jax.random.normal(next(keys), (dec_vocab, dec_emb_dim),
                                     jnp.float32) * 0.1

    be = 1.0 / math.sqrt(enc_hidden)
    p["enc_gru"] = []
    for l in range(enc_layers):
        d_in = enc_emb_dim if l == 0 else enc_hidden
        layer = tuple(
            [_uniform(next(keys), (d_in, enc_hidden), be) for _ in range(3)]         # wih r,z,n
            + [_uniform(next(keys), (enc_hidden, enc_hidden), be) for _ in range(3)]  # whh r,z,n
            + [_uniform(next(keys), (1, enc_hidden), be) for _ in range(6)])          # bih, bhh
        p["enc_gru"].append(layer)

    bd = 1.0 / math.sqrt(dec_hidden)
    p["dec_gru"] = []
    # Decoder layer 0: input = [embedding ; context]; emb/ctx halves stored separately
    # so the embedding half can be hoisted out of the recurrence.
    layer0 = tuple(
        [_uniform(next(keys), (dec_emb_dim, dec_hidden), bd) for _ in range(3)]      # wih_emb
        + [_uniform(next(keys), (enc_hidden, dec_hidden), bd) for _ in range(3)]     # wih_ctx
        + [_uniform(next(keys), (dec_hidden, dec_hidden), bd) for _ in range(3)]     # whh
        + [_uniform(next(keys), (1, dec_hidden), bd) for _ in range(6)])             # bih, bhh
    p["dec_gru"].append(layer0)
    for l in range(1, dec_layers):
        layer = tuple(
            [_uniform(next(keys), (dec_hidden, dec_hidden), bd) for _ in range(3)]
            + [_uniform(next(keys), (dec_hidden, dec_hidden), bd) for _ in range(3)]
            + [_uniform(next(keys), (1, dec_hidden), bd) for _ in range(6)])
        p["dec_gru"].append(layer)

    p["w_out"] = _uniform(next(keys), (dec_hidden, dec_vocab), bd)
    p["b_out"] = _uniform(next(keys), (1, dec_vocab), bd)
    return p


# ---------------------------------------------------------------------------
# Full Seq2Seq forward. Embedding gathers / tiny layout transposes are XLA glue;
# GRU recurrences, attention and the vocab projection run in Pallas kernels.
# ---------------------------------------------------------------------------
@jax.jit
def seq2seq_forward(params, inputs, target):
    B, T_enc = inputs.shape
    _, T_dec = target.shape
    H = params["enc_gru"][0][3].shape[0]

    # ---- Encoder (one fused pallas_call for all layers) ----
    # Gather embeddings directly in (time, batch)-flattened order: avoids a big
    # activation transpose in the wrapper.
    x_flat = params["enc_emb"][jnp.transpose(inputs).reshape(-1)]      # (T_enc*B, E)
    enc_out_flat, enc_hidden = run_encoder(x_flat, params["enc_gru"], T_enc, B)
    enc_out_bm = jnp.transpose(enc_out_flat.reshape(T_enc, B, H), (1, 0, 2))  # (B,T_enc,H)

    # ---- Decoder (attention + GRU stack; initial hidden = encoder hidden) ----
    tgt_flat = params["dec_emb"][jnp.transpose(target).reshape(-1)]    # (T_dec*B, E)
    htop_flat, dec_hidden = run_decoder(tgt_flat, enc_out_bm, enc_hidden,
                                        params["dec_gru"], T_dec, B)

    # ---- Vocab projection: single big GEMM, gridded/parallel over vocab tiles ----
    htop_bm = jnp.transpose(htop_flat.reshape(T_dec, B, H), (1, 0, 2))  # (B, T_dec, H)
    logits = run_projection(htop_bm.reshape(B * T_dec, H),
                            params["w_out"], params["b_out"])
    decoder_outputs = logits.reshape(B, T_dec, -1)                      # (B, T_dec, V)
    return decoder_outputs, dec_hidden


if __name__ == "__main__":
    ENC_VOCAB, ENC_EMB, ENC_HID, ENC_LAYERS = 32, 16, 32, 2
    DEC_VOCAB, DEC_EMB, DEC_LAYERS, DEC_HID = 32, 16, 2, 32
    B, T_ENC, T_DEC = 2, 8, 8

    key = jax.random.PRNGKey(0)
    k_param, k_in, k_tgt = jax.random.split(key, 3)
    params = init_params(k_param, ENC_VOCAB, ENC_EMB, ENC_HID, ENC_LAYERS,
                         DEC_VOCAB, DEC_EMB, DEC_LAYERS, DEC_HID)
    inputs = jax.random.randint(k_in, (B, T_ENC), 0, ENC_VOCAB, jnp.int32)
    target = jax.random.randint(k_tgt, (B, T_DEC), 0, DEC_VOCAB, jnp.int32)

    dec_out, dec_hidden = seq2seq_forward(params, inputs, target)
    jax.block_until_ready((dec_out, dec_hidden))

    assert dec_out.shape == (B, T_DEC, DEC_VOCAB), dec_out.shape
    assert dec_hidden.shape == (DEC_LAYERS, B, DEC_HID), dec_hidden.shape
    assert bool(jnp.all(jnp.isfinite(dec_out)))
    assert bool(jnp.all(jnp.isfinite(dec_hidden)))
    print("KERNEL_OK")
</pallas_src>

<mosaic_0001>
module attributes {stable_mosaic.version = 11 : i64} {
  func.func @_proj_kernel(%arg0: i32, %arg1: memref<16x32xf32, #tpu.memory_space<vmem>>, %arg2: memref<32x32xf32, #tpu.memory_space<vmem>>, %arg3: memref<1x32xf32, #tpu.memory_space<vmem>>, %arg4: memref<16x32xf32, #tpu.memory_space<vmem>>) attributes {dimension_semantics = [#tpu.dimension_semantics<parallel>], iteration_bounds = array<i64: 1>, scalar_prefetch = 0 : i64, scratch_operands = 0 : i64, tpu.core_type = #tpu.core_type<tc>, window_params = [{pipeline_mode = #tpu.pipeline_mode<synchronous>, transform_indices = @transform_0, window_bounds = array<i64: 16, 32>}, {transform_indices = @transform_1, window_bounds = array<i64: 32, 32>}, {transform_indices = @transform_2, window_bounds = array<i64: 1, 32>}, {transform_indices = @transform_3, window_bounds = array<i64: 16, 32>}]} {
    %c0 = arith.constant 0 : index
    %c0_0 = arith.constant 0 : index
    %0 = vector.load %arg1[%c0, %c0_0] : memref<16x32xf32, #tpu.memory_space<vmem>>, vector<16x32xf32>
    %c0_1 = arith.constant 0 : index
    %c0_2 = arith.constant 0 : index
    %1 = vector.load %arg2[%c0_1, %c0_2] : memref<32x32xf32, #tpu.memory_space<vmem>>, vector<32x32xf32>
    %cst = arith.constant dense<0.000000e+00> : vector<16x32xf32>
    %2 = tpu.matmul %0, %1, %cst {dimension_numbers = #tpu.dot_dimension_numbers<[1], [0], [0], [1], [0, 0, 1, 1], [], []>} : vector<16x32xf32>, vector<32x32xf32>, vector<16x32xf32> -> vector<16x32xf32>
    %c0_3 = arith.constant 0 : index
    %c0_4 = arith.constant 0 : index
    %3 = vector.load %arg3[%c0_3, %c0_4] : memref<1x32xf32, #tpu.memory_space<vmem>>, vector<1x32xf32>
    %4 = vector.broadcast %3 : vector<1x32xf32> to vector<16x32xf32>
    %5 = arith.addf %2, %4 : vector<16x32xf32>
    %c0_5 = arith.constant 0 : index
    %c0_6 = arith.constant 0 : index
    %6 = vector.load %arg4[%c0_5, %c0_6] : memref<16x32xf32, #tpu.memory_space<vmem>>, vector<16x32xf32>
    tpu.vector_store %arg4[%c0_5, %c0_6], %5 {strides = array<i32>} : memref<16x32xf32, #tpu.memory_space<vmem>>, vector<16x32xf32>,
    return
  }
  func.func @transform_0(%arg0: i32) -> (i32, i32) {
    %c0_i32 = arith.constant 0 : i32
    %c0_i32_0 = arith.constant 0 : i32
    %c0_i32_1 = arith.constant 0 : i32
    return %c0_i32, %c0_i32_0 : i32, i32
  }
  func.func @transform_1(%arg0: i32) -> (i32, i32) {
    %c0_i32 = arith.constant 0 : i32
    %c0_i32_0 = arith.constant 0 : i32
    return %c0_i32, %arg0 : i32, i32
  }
  func.func @transform_2(%arg0: i32) -> (i32, i32) {
    %c0_i32 = arith.constant 0 : i32
    %c0_i32_0 = arith.constant 0 : i32
    return %c0_i32, %arg0 : i32, i32
  }
  func.func @transform_3(%arg0: i32) -> (i32, i32) {
    %c0_i32 = arith.constant 0 : i32
    %c0_i32_0 = arith.constant 0 : i32
    return %c0_i32, %arg0 : i32, i32
  }
}

module attributes {stable_mosaic.version = 11 : i64} {
  func.func @kernel(%arg0: memref<16x16xf32, #tpu.memory_space<vmem>>, %arg1: memref<2x8x32xf32, #tpu.memory_space<vmem>>, %arg2: memref<2x2x32xf32, #tpu.memory_space<vmem>>, %arg3: memref<16x32xf32, #tpu.memory_space<vmem>>, %arg4: memref<16x32xf32, #tpu.memory_space<vmem>>, %arg5: memref<16x32xf32, #tpu.memory_space<vmem>>, %arg6: memref<32x32xf32, #tpu.memory_space<vmem>>, %arg7: memref<32x32xf32, #tpu.memory_space<vmem>>, %arg8: memref<32x32xf32, #tpu.memory_space<vmem>>, %arg9: memref<32x32xf32, #tpu.memory_space<vmem>>, %arg10: memref<32x32xf32, #tpu.memory_space<vmem>>, %arg11: memref<32x32xf32, #tpu.memory_space<vmem>>, %arg12: memref<1x32xf32, #tpu.memory_space<vmem>>, %arg13: memref<1x32xf32, #tpu.memory_space<vmem>>, %arg14: memref<1x32xf32, #tpu.memory_space<vmem>>, %arg15: memref<1x32xf32, #tpu.memory_space<vmem>>, %arg16: memref<1x32xf32, #tpu.memory_space<vmem>>, %arg17: memref<1x32xf32, #tpu.memory_space<vmem>>, %arg18: memref<32x32xf32, #tpu.memory_space<vmem>>, %arg19: memref<32x32xf32, #tpu.memory_space<vmem>>, %arg20: memref<32x32xf32, #tpu.memory_space<vmem>>, %arg21: memref<32x32xf32, #tpu.memory_space<vmem>>, %arg22: memref<32x32xf32, #tpu.memory_space<vmem>>, %arg23: memref<32x32xf32, #tpu.memory_space<vmem>>, %arg24: memref<1x32xf32, #tpu.memory_space<vmem>>, %arg25: memref<1x32xf32, #tpu.memory_space<vmem>>, %arg26: memref<1x32xf32, #tpu.memory_space<vmem>>, %arg27: memref<1x32xf32, #tpu.memory_space<vmem>>, %arg28: memref<1x32xf32, #tpu.memory_space<vmem>>, %arg29: memref<1x32xf32, #tpu.memory_space<vmem>>, %arg30: memref<16x32xf32, #tpu.memory_space<vmem>>, %arg31: memref<2x2x32xf32, #tpu.memory_space<vmem>>, %arg32: memref<2x2x32xf32, #tpu.memory_space<vmem>>, %arg33: memref<16x32xf32, #tpu.memory_space<vmem>>, %arg34: memref<16x32xf32, #tpu.memory_space<vmem>>, %arg35: memref<16x32xf32, #tpu.memory_space<vmem>>) attributes {dimension_semantics = [], scalar_prefetch = 0 : i64, scratch_operands = 4 : i64, tpu.core_type = #tpu.core_type<tc>} {
    %c0 = arith.constant 0 : index
    %c0_0 = arith.constant 0 : index
    %c0_1 = arith.constant 0 : index
    %0 = vector.load %arg2[%c0, %c0_0, %c0_1] : memref<2x2x32xf32, #tpu.memory_space<vmem>>, vector<2x2x32xf32>
    %c0_2 = arith.constant 0 : index
    %c0_3 = arith.constant 0 : index
    %c0_4 = arith.constant 0 : index
    %1 = vector.load %arg32[%c0_2, %c0_3, %c0_4] : memref<2x2x32xf32, #tpu.memory_space<vmem>>, vector<2x2x32xf32>
    tpu.vector_store %arg32[%c0_2, %c0_3, %c0_4], %0 {strides = array<i32>} : memref<2x2x32xf32, #tpu.memory_space<vmem>>, vector<2x2x32xf32>,
    %c0_5 = arith.constant 0 : index
    %c0_6 = arith.constant 0 : index
    %2 = vector.load %arg0[%c0_5, %c0_6] : memref<16x16xf32, #tpu.memory_space<vmem>>, vector<16x16xf32>
    %c0_7 = arith.constant 0 : index
    %c0_8 = arith.constant 0 : index
    %3 = vector.load %arg3[%c0_7, %c0_8] : memref<16x32xf32, #tpu.memory_space<vmem>>, vector<16x32xf32>
    %cst = arith.constant dense<0.000000e+00> : vector<16x32xf32>
    %4 = tpu.matmul %2, %3, %cst {dimension_numbers = #tpu.dot_dimension_numbers<[1], [0], [0], [1], [0, 0, 1, 1], [], []>} : vector<16x16xf32>, vector<16x32xf32>, vector<16x32xf32> -> vector<16x32xf32>
    %c0_9 = arith.constant 0 : index
    %c0_10 = arith.constant 0 : index
    %5 = vector.load %arg12[%c0_9, %c0_10] : memref<1x32xf32, #tpu.memory_space<vmem>>, vector<1x32xf32>
    %6 = vector.broadcast %5 : vector<1x32xf32> to vector<16x32xf32>
    %7 = arith.addf %4, %6 : vector<16x32xf32>
    %c0_11 = arith.constant 0 : index
    %c0_12 = arith.constant 0 : index
    %8 = vector.load %arg33[%c0_11, %c0_12] : memref<16x32xf32, #tpu.memory_space<vmem>>, vector<16x32xf32>
    tpu.vector_store %arg33[%c0_11, %c0_12], %7 {strides = array<i32>} : memref<16x32xf32, #tpu.memory_space<vmem>>, vector<16x32xf32>,
    %c0_13 = arith.constant 0 : index
    %c0_14 = arith.constant 0 : index
    %9 = vector.load %arg4[%c0_13, %c0_14] : memref<16x32xf32, #tpu.memory_space<vmem>>, vector<16x32xf32>
    %cst_15 = arith.constant dense<0.000000e+00> : vector<16x32xf32>
    %10 = tpu.matmul %2, %9, %cst_15 {dimension_numbers = #tpu.dot_dimension_numbers<[1], [0], [0], [1], [0, 0, 1, 1], [], []>} : vector<16x16xf32>, vector<16x32xf32>, vector<16x32xf32> -> vector<16x32xf32>
    %c0_16 = arith.constant 0 : index
    %c0_17 = arith.constant 0 : index
    %11 = vector.load %arg13[%c0_16, %c0_17] : memref<1x32xf32, #tpu.memory_space<vmem>>, vector<1x32xf32>
    %12 = vector.broadcast %11 : vector<1x32xf32> to vector<16x32xf32>
    %13 = arith.addf %10, %12 : vector<16x32xf32>
    %c0_18 = arith.constant 0 : index
    %c0_19 = arith.constant 0 : index
    %14 = vector.load %arg34[%c0_18, %c0_19] : memref<16x32xf32, #tpu.memory_space<vmem>>, vector<16x32xf32>
    tpu.vector_store %arg34[%c0_18, %c0_19], %13 {strides = array<i32>} : memref<16x32xf32, #tpu.memory_space<vmem>>, vector<16x32xf32>,
    %c0_20 = arith.constant 0 : index
    %c0_21 = arith.constant 0 : index
    %15 = vector.load %arg5[%c0_20, %c0_21] : memref<16x32xf32, #tpu.memory_space<vmem>>, vector<16x32xf32>
    %cst_22 = arith.constant dense<0.000000e+00> : vector<16x32xf32>
    %16 = tpu.matmul %2, %15, %cst_22 {dimension_numbers = #tpu.dot_dimension_numbers<[1], [0], [0], [1], [0, 0, 1, 1], [], []>} : vector<16x16xf32>, vector<16x32xf32>, vector<16x32xf32> -> vector<16x32xf32>
    %c0_23 = arith.constant 0 : index
    %c0_24 = arith.constant 0 : index
    %17 = vector.load %arg14[%c0_23, %c0_24] : memref<1x32xf32, #tpu.memory_space<vmem>>, vector<1x32xf32>
    %18 = vector.broadcast %17 : vector<1x32xf32> to vector<16x32xf32>
    %19 = arith.addf %16, %18 : vector<16x32xf32>
    %c0_25 = arith.constant 0 : index
    %c0_26 = arith.constant 0 : index
    %20 = vector.load %arg35[%c0_25, %c0_26] : memref<16x32xf32, #tpu.memory_space<vmem>>, vector<16x32xf32>
    tpu.vector_store %arg35[%c0_25, %c0_26], %19 {strides = array<i32>} : memref<16x32xf32, #tpu.memory_space<vmem>>, vector<16x32xf32>,
    %c0_i32 = arith.constant 0 : i32
    %c8_i32 = arith.constant 8 : i32
    %21 = arith.addi %c0_i32, %c8_i32 : i32
    %c1_i32 = arith.constant 1 : i32
    scf.for %arg36 = %c0_i32 to %21 step %c1_i32  : i32 {
      %c2_i32 = arith.constant 2 : i32
      %24 = arith.muli %arg36, %c2_i32 : i32
      %c0_34 = arith.constant 0 : index
      %c0_35 = arith.constant 0 : index
      %c0_36 = arith.constant 0 : index
      %25 = vector.load %arg1[%c0_34, %c0_35, %c0_36] : memref<2x8x32xf32, #tpu.memory_space<vmem>>, vector<2x8x32xf32>
      %c1 = arith.constant 1 : index
      %c0_37 = arith.constant 0 : index
      %c0_38 = arith.constant 0 : index
      %26 = vector.load %arg32[%c1, %c0_37, %c0_38] : memref<2x2x32xf32, #tpu.memory_space<vmem>>, vector<1x2x32xf32>
      %27 = vector.shape_cast %26 : vector<1x2x32xf32> to vector<2x32xf32>
      %28 = vector.shape_cast %27 : vector<2x32xf32> to vector<2x1x32xf32>
      "tpu.trace_start"() <{level = 10 : i32, message = "bqh,bth->bqt"}> : () -> ()
      %cst_39 = arith.constant dense<0.000000e+00> : vector<2x1x8xf32>
      %29 = tpu.matmul %28, %25, %cst_39 {dimension_numbers = #tpu.dot_dimension_numbers<[2], [2], [1], [1], [0, 0, 0, 1, 1, 1], [0], [0]>} : vector<2x1x32xf32>, vector<2x8x32xf32>, vector<2x1x8xf32> -> vector<2x1x8xf32>
      "tpu.trace_stop"() : () -> ()
      %cst_40 = arith.constant dense<0xFF800000> : vector<2x1xf32>
      %30 = vector.multi_reduction <maximumf>, %29, %cst_40 [2] : vector<2x1x8xf32> to vector<2x1xf32>
      %31 = vector.shape_cast %30 : vector<2x1xf32> to vector<2x1x1xf32>
      %32 = vector.broadcast %31 : vector<2x1x1xf32> to vector<2x1x8xf32>
      %33 = arith.subf %29, %32 : vector<2x1x8xf32>
      %34 = math.exp %33 : vector<2x1x8xf32>
      %cst_41 = arith.constant dense<0.000000e+00> : vector<2x1xf32>
      %35 = vector.multi_reduction <add>, %34, %cst_41 [2] : vector<2x1x8xf32> to vector<2x1xf32>
      %36 = vector.shape_cast %35 : vector<2x1xf32> to vector<2x1x1xf32>
      %37 = tpu.reciprocal %36 {approx = true} : vector<2x1x1xf32> -> vector<2x1x1xf32>
      %38 = vector.broadcast %37 : vector<2x1x1xf32> to vector<2x1x8xf32>
      %39 = arith.mulf %34, %38 : vector<2x1x8xf32>
      "tpu.trace_start"() <{level = 10 : i32, message = "bqt,bth->bqh"}> : () -> ()
      %cst_42 = arith.constant dense<0.000000e+00> : vector<2x1x32xf32>
      %40 = tpu.matmul %39, %25, %cst_42 {dimension_numbers = #tpu.dot_dimension_numbers<[2], [1], [1], [2], [0, 0, 0, 1, 1, 2], [0], [0]>} : vector<2x1x8xf32>, vector<2x8x32xf32>, vector<2x1x32xf32> -> vector<2x1x32xf32>
      "tpu.trace_stop"() : () -> ()
      %41 = vector.shape_cast %40 : vector<2x1x32xf32> to vector<2x32xf32>
      %c0_43 = arith.constant 0 : index
      %c0_44 = arith.constant 0 : index
      %c0_45 = arith.constant 0 : index
      %42 = vector.load %arg32[%c0_43, %c0_44, %c0_45] : memref<2x2x32xf32, #tpu.memory_space<vmem>>, vector<1x2x32xf32>
      %43 = vector.shape_cast %42 : vector<1x2x32xf32> to vector<2x32xf32>
      %44 = arith.index_cast %24 : i32 to index
      %c0_46 = arith.constant 0 : index
      %45 = vector.load %arg33[%44, %c0_46] : memref<16x32xf32, #tpu.memory_space<vmem>>, vector<2x32xf32>
      %c0_47 = arith.constant 0 : index
      %c0_48 = arith.constant 0 : index
      %46 = vector.load %arg6[%c0_47, %c0_48] : memref<32x32xf32, #tpu.memory_space<vmem>>, vector<32x32xf32>
      %cst_49 = arith.constant dense<0.000000e+00> : vector<2x32xf32>
      %47 = tpu.matmul %41, %46, %cst_49 {dimension_numbers = #tpu.dot_dimension_numbers<[1], [0], [0], [1], [0, 0, 1, 1], [], []>} : vector<2x32xf32>, vector<32x32xf32>, vector<2x32xf32> -> vector<2x32xf32>
      %48 = arith.addf %45, %47 : vector<2x32xf32>
      %49 = arith.index_cast %24 : i32 to index
      %c0_50 = arith.constant 0 : index
      %50 = vector.load %arg34[%49, %c0_50] : memref<16x32xf32, #tpu.memory_space<vmem>>, vector<2x32xf32>
      %c0_51 = arith.constant 0 : index
      %c0_52 = arith.constant 0 : index
      %51 = vector.load %arg7[%c0_51, %c0_52] : memref<32x32xf32, #tpu.memory_space<vmem>>, vector<32x32xf32>
      %cst_53 = arith.constant dense<0.000000e+00> : vector<2x32xf32>
      %52 = tpu.matmul %41, %51, %cst_53 {dimension_numbers = #tpu.dot_dimension_numbers<[1], [0], [0], [1], [0, 0, 1, 1], [], []>} : vector<2x32xf32>, vector<32x32xf32>, vector<2x32xf32> -> vector<2x32xf32>
      %53 = arith.addf %50, %52 : vector<2x32xf32>
      %54 = arith.index_cast %24 : i32 to index
      %c0_54 = arith.constant 0 : index
      %55 = vector.load %arg35[%54, %c0_54] : memref<16x32xf32, #tpu.memory_space<vmem>>, vector<2x32xf32>
      %c0_55 = arith.constant 0 : index
      %c0_56 = arith.constant 0 : index
      %56 = vector.load %arg8[%c0_55, %c0_56] : memref<32x32xf32, #tpu.memory_space<vmem>>, vector<32x32xf32>
      %cst_57 = arith.constant dense<0.000000e+00> : vector<2x32xf32>
      %57 = tpu.matmul %41, %56, %cst_57 {dimension_numbers = #tpu.dot_dimension_numbers<[1], [0], [0], [1], [0, 0, 1, 1], [], []>} : vector<2x32xf32>, vector<32x32xf32>, vector<2x32xf32> -> vector<2x32xf32>
      %58 = arith.addf %55, %57 : vector<2x32xf32>
      %c0_58 = arith.constant 0 : index
      %c0_59 = arith.constant 0 : index
      %59 = vector.load %arg9[%c0_58, %c0_59] : memref<32x32xf32, #tpu.memory_space<vmem>>, vector<32x32xf32>
      %cst_60 = arith.constant dense<0.000000e+00> : vector<2x32xf32>
      %60 = tpu.matmul %43, %59, %cst_60 {dimension_numbers = #tpu.dot_dimension_numbers<[1], [0], [0], [1], [0, 0, 1, 1], [], []>} : vector<2x32xf32>, vector<32x32xf32>, vector<2x32xf32> -> vector<2x32xf32>
      %c0_61 = arith.constant 0 : index
      %c0_62 = arith.constant 0 : index
      %61 = vector.load %arg15[%c0_61, %c0_62] : memref<1x32xf32, #tpu.memory_space<vmem>>, vector<1x32xf32>
      %62 = vector.broadcast %61 : vector<1x32xf32> to vector<2x32xf32>
      %63 = arith.addf %60, %62 : vector<2x32xf32>
      %c0_63 = arith.constant 0 : index
      %c0_64 = arith.constant 0 : index
      %64 = vector.load %arg10[%c0_63, %c0_64] : memref<32x32xf32, #tpu.memory_space<vmem>>, vector<32x32xf32>
      %cst_65 = arith.constant dense<0.000000e+00> : vector<2x32xf32>
      %65 = tpu.matmul %43, %64, %cst_65 {dimension_numbers = #tpu.dot_dimension_numbers<[1], [0], [0], [1], [0, 0, 1, 1], [], []>} : vector<2x32xf32>, vector<32x32xf32>, vector<2x32xf32> -> vector<2x32xf32>
      %c0_66 = arith.constant 0 : index
      %c0_67 = arith.constant 0 : index
      %66 = vector.load %arg16[%c0_66, %c0_67] : memref<1x32xf32, #tpu.memory_space<vmem>>, vector<1x32xf32>
      %67 = vector.broadcast %66 : vector<1x32xf32> to vector<2x32xf32>
      %68 = arith.addf %65, %67 : vector<2x32xf32>
      %c0_68 = arith.constant 0 : index
      %c0_69 = arith.constant 0 : index
      %69 = vector.load %arg11[%c0_68, %c0_69] : memref<32x32xf32, #tpu.memory_space<vmem>>, vector<32x32xf32>
      %cst_70 = arith.constant dense<0.000000e+00> : vector<2x32xf32>
      %70 = tpu.matmul %43, %69, %cst_70 {dimension_numbers = #tpu.dot_dimension_numbers<[1], [0], [0], [1], [0, 0, 1, 1], [], []>} : vector<2x32xf32>, vector<32x32xf32>, vector<2x32xf32> -> vector<2x32xf32>
      %c0_71 = arith.constant 0 : index
      %c0_72 = arith.constant 0 : index
      %71 = vector.load %arg17[%c0_71, %c0_72] : memref<1x32xf32, #tpu.memory_space<vmem>>, vector<1x32xf32>
      %72 = vector.broadcast %71 : vector<1x32xf32> to vector<2x32xf32>
      %73 = arith.addf %70, %72 : vector<2x32xf32>
      %74 = arith.addf %48, %63 : vector<2x32xf32>
      %75 = arith.negf %74 : vector<2x32xf32>
      %76 = math.exp %75 : vector<2x32xf32>
      %cst_73 = arith.constant 1.000000e+00 : f32
      %77 = vector.broadcast %cst_73 : f32 to vector<2x32xf32>
      %78 = arith.addf %77, %76 : vector<2x32xf32>
      %79 = arith.divf %77, %78 : vector<2x32xf32>
      %80 = arith.addf %53, %68 : vector<2x32xf32>
      %81 = arith.negf %80 : vector<2x32xf32>
      %82 = math.exp %81 : vector<2x32xf32>
      %cst_74 = arith.constant 1.000000e+00 : f32
      %83 = vector.broadcast %cst_74 : f32 to vector<2x32xf32>
      %84 = arith.addf %83, %82 : vector<2x32xf32>
      %85 = arith.divf %83, %84 : vector<2x32xf32>
      %86 = arith.mulf %79, %73 : vector<2x32xf32>
      %87 = arith.addf %58, %86 : vector<2x32xf32>
      %88 = math.tanh %87 : vector<2x32xf32>
      %cst_75 = arith.constant 1.000000e+00 : f32
      %89 = vector.broadcast %cst_75 : f32 to vector<2x32xf32>
      %90 = arith.subf %89, %85 : vector<2x32xf32>
      %91 = arith.mulf %90, %88 : vector<2x32xf32>
      %92 = arith.mulf %85, %43 : vector<2x32xf32>
      %93 = arith.addf %91, %92 : vector<2x32xf32>
      %c0_76 = arith.constant 0 : index
      %c0_77 = arith.constant 0 : index
      %c0_78 = arith.constant 0 : index
      %94 = vector.load %arg32[%c0_76, %c0_77, %c0_78] : memref<2x2x32xf32, #tpu.memory_space<vmem>>, vector<1x2x32xf32>
      %95 = vector.shape_cast %94 : vector<1x2x32xf32> to vector<2x32xf32>
      %96 = vector.shape_cast %93 : vector<2x32xf32> to vector<1x2x32xf32>
      tpu.vector_store %arg32[%c0_76, %c0_77, %c0_78], %96 {strides = array<i32>} : memref<2x2x32xf32, #tpu.memory_space<vmem>>, vector<1x2x32xf32>,
      %c1_79 = arith.constant 1 : index
      %c0_80 = arith.constant 0 : index
      %c0_81 = arith.constant 0 : index
      %97 = vector.load %arg32[%c1_79, %c0_80, %c0_81] : memref<2x2x32xf32, #tpu.memory_space<vmem>>, vector<1x2x32xf32>
      %98 = vector.shape_cast %97 : vector<1x2x32xf32> to vector<2x32xf32>
      %c0_82 = arith.constant 0 : index
      %c0_83 = arith.constant 0 : index
      %99 = vector.load %arg18[%c0_82, %c0_83] : memref<32x32xf32, #tpu.memory_space<vmem>>, vector<32x32xf32>
      %cst_84 = arith.constant dense<0.000000e+00> : vector<2x32xf32>
      %100 = tpu.matmul %93, %99, %cst_84 {dimension_numbers = #tpu.dot_dimension_numbers<[1], [0], [0], [1], [0, 0, 1, 1], [], []>} : vector<2x32xf32>, vector<32x32xf32>, vector<2x32xf32> -> vector<2x32xf32>
      %c0_85 = arith.constant 0 : index
      %c0_86 = arith.constant 0 : index
      %101 = vector.load %arg24[%c0_85, %c0_86] : memref<1x32xf32, #tpu.memory_space<vmem>>, vector<1x32xf32>
      %102 = vector.broadcast %101 : vector<1x32xf32> to vector<2x32xf32>
      %103 = arith.addf %100, %102 : vector<2x32xf32>
      %c0_87 = arith.constant 0 : index
      %c0_88 = arith.constant 0 : index
      %104 = vector.load %arg19[%c0_87, %c0_88] : memref<32x32xf32, #tpu.memory_space<vmem>>, vector<32x32xf32>
      %cst_89 = arith.constant dense<0.000000e+00> : vector<2x32xf32>
      %105 = tpu.matmul %93, %104, %cst_89 {dimension_numbers = #tpu.dot_dimension_numbers<[1], [0], [0], [1], [0, 0, 1, 1], [], []>} : vector<2x32xf32>, vector<32x32xf32>, vector<2x32xf32> -> vector<2x32xf32>
      %c0_90 = arith.constant 0 : index
      %c0_91 = arith.constant 0 : index
      %106 = vector.load %arg25[%c0_90, %c0_91] : memref<1x32xf32, #tpu.memory_space<vmem>>, vector<1x32xf32>
      %107 = vector.broadcast %106 : vector<1x32xf32> to vector<2x32xf32>
      %108 = arith.addf %105, %107 : vector<2x32xf32>
      %c0_92 = arith.constant 0 : index
      %c0_93 = arith.constant 0 : index
      %109 = vector.load %arg20[%c0_92, %c0_93] : memref<32x32xf32, #tpu.memory_space<vmem>>, vector<32x32xf32>
      %cst_94 = arith.constant dense<0.000000e+00> : vector<2x32xf32>
      %110 = tpu.matmul %93, %109, %cst_94 {dimension_numbers = #tpu.dot_dimension_numbers<[1], [0], [0], [1], [0, 0, 1, 1], [], []>} : vector<2x32xf32>, vector<32x32xf32>, vector<2x32xf32> -> vector<2x32xf32>
      %c0_95 = arith.constant 0 : index
      %c0_96 = arith.constant 0 : index
      %111 = vector.load %arg26[%c0_95, %c0_96] : memref<1x32xf32, #tpu.memory_space<vmem>>, vector<1x32xf32>
      %112 = vector.broadcast %111 : vector<1x32xf32> to vector<2x32xf32>
      %113 = arith.addf %110, %112 : vector<2x32xf32>
      %c0_97 = arith.constant 0 : index
      %c0_98 = arith.constant 0 : index
      %114 = vector.load %arg21[%c0_97, %c0_98] : memref<32x32xf32, #tpu.memory_space<vmem>>, vector<32x32xf32>
      %cst_99 = arith.constant dense<0.000000e+00> : vector<2x32xf32>
      %115 = tpu.matmul %98, %114, %cst_99 {dimension_numbers = #tpu.dot_dimension_numbers<[1], [0], [0], [1], [0, 0, 1, 1], [], []>} : vector<2x32xf32>, vector<32x32xf32>, vector<2x32xf32> -> vector<2x32xf32>
      %c0_100 = arith.constant 0 : index
      %c0_101 = arith.constant 0 : index
      %116 = vector.load %arg27[%c0_100, %c0_101] : memref<1x32xf32, #tpu.memory_space<vmem>>, vector<1x32xf32>
      %117 = vector.broadcast %116 : vector<1x32xf32> to vector<2x32xf32>
      %118 = arith.addf %115, %117 : vector<2x32xf32>
      %c0_102 = arith.constant 0 : index
      %c0_103 = arith.constant 0 : index
      %119 = vector.load %arg22[%c0_102, %c0_103] : memref<32x32xf32, #tpu.memory_space<vmem>>, vector<32x32xf32>
      %cst_104 = arith.constant dense<0.000000e+00> : vector<2x32xf32>
      %120 = tpu.matmul %98, %119, %cst_104 {dimension_numbers = #tpu.dot_dimension_numbers<[1], [0], [0], [1], [0, 0, 1, 1], [], []>} : vector<2x32xf32>, vector<32x32xf32>, vector<2x32xf32> -> vector<2x32xf32>
      %c0_105 = arith.constant 0 : index
      %c0_106 = arith.constant 0 : index
      %121 = vector.load %arg28[%c0_105, %c0_106] : memref<1x32xf32, #tpu.memory_space<vmem>>, vector<1x32xf32>
      %122 = vector.broadcast %121 : vector<1x32xf32> to vector<2x32xf32>
      %123 = arith.addf %120, %122 : vector<2x32xf32>
      %c0_107 = arith.constant 0 : index
      %c0_108 = arith.constant 0 : index
      %124 = vector.load %arg23[%c0_107, %c0_108] : memref<32x32xf32, #tpu.memory_space<vmem>>, vector<32x32xf32>
      %cst_109 = arith.constant dense<0.000000e+00> : vector<2x32xf32>
      %125 = tpu.matmul %98, %124, %cst_109 {dimension_numbers = #tpu.dot_dimension_numbers<[1], [0], [0], [1], [0, 0, 1, 1], [], []>} : vector<2x32xf32>, vector<32x32xf32>, vector<2x32xf32> -> vector<2x32xf32>
      %c0_110 = arith.constant 0 : index
      %c0_111 = arith.constant 0 : index
      %126 = vector.load %arg29[%c0_110, %c0_111] : memref<1x32xf32, #tpu.memory_space<vmem>>, vector<1x32xf32>
      %127 = vector.broadcast %126 : vector<1x32xf32> to vector<2x32xf32>
      %128 = arith.addf %125, %127 : vector<2x32xf32>
      %129 = arith.addf %103, %118 : vector<2x32xf32>
      %130 = arith.negf %129 : vector<2x32xf32>
      %131 = math.exp %130 : vector<2x32xf32>
      %cst_112 = arith.constant 1.000000e+00 : f32
      %132 = vector.broadcast %cst_112 : f32 to vector<2x32xf32>
      %133 = arith.addf %132, %131 : vector<2x32xf32>
      %134 = arith.divf %132, %133 : vector<2x32xf32>
      %135 = arith.addf %108, %123 : vector<2x32xf32>
      %136 = arith.negf %135 : vector<2x32xf32>
      %137 = math.exp %136 : vector<2x32xf32>
      %cst_113 = arith.constant 1.000000e+00 : f32
      %138 = vector.broadcast %cst_113 : f32 to vector<2x32xf32>
      %139 = arith.addf %138, %137 : vector<2x32xf32>
      %140 = arith.divf %138, %139 : vector<2x32xf32>
      %141 = arith.mulf %134, %128 : vector<2x32xf32>
      %142 = arith.addf %113, %141 : vector<2x32xf32>
      %143 = math.tanh %142 : vector<2x32xf32>
      %cst_114 = arith.constant 1.000000e+00 : f32
      %144 = vector.broadcast %cst_114 : f32 to vector<2x32xf32>
      %145 = arith.subf %144, %140 : vector<2x32xf32>
      %146 = arith.mulf %145, %143 : vector<2x32xf32>
      %147 = arith.mulf %140, %98 : vector<2x32xf32>
      %148 = arith.addf %146, %147 : vector<2x32xf32>
      %c1_115 = arith.constant 1 : index
      %c0_116 = arith.constant 0 : index
      %c0_117 = arith.constant 0 : index
      %149 = vector.load %arg32[%c1_115, %c0_116, %c0_117] : memref<2x2x32xf32, #tpu.memory_space<vmem>>, vector<1x2x32xf32>
      %150 = vector.shape_cast %149 : vector<1x2x32xf32> to vector<2x32xf32>
      %151 = vector.shape_cast %148 : vector<2x32xf32> to vector<1x2x32xf32>
      tpu.vector_store %arg32[%c1_115, %c0_116, %c0_117], %151 {strides = array<i32>} : memref<2x2x32xf32, #tpu.memory_space<vmem>>, vector<1x2x32xf32>,
      %152 = arith.index_cast %24 : i32 to index
      %c0_118 = arith.constant 0 : index
      %153 = vector.load %arg30[%152, %c0_118] : memref<16x32xf32, #tpu.memory_space<vmem>>, vector<2x32xf32>
      tpu.vector_store %arg30[%152, %c0_118], %148 {strides = array<i32>} : memref<16x32xf32, #tpu.memory_space<vmem>>, vector<2x32xf32>,
    }
    %c8_i32_27 = arith.constant 8 : i32
    %c0_28 = arith.constant 0 : index
    %c0_29 = arith.constant 0 : index
    %c0_30 = arith.constant 0 : index
    %22 = vector.load %arg32[%c0_28, %c0_29, %c0_30] : memref<2x2x32xf32, #tpu.memory_space<vmem>>, vector<2x2x32xf32>
    %c0_31 = arith.constant 0 : index
    %c0_32 = arith.constant 0 : index
    %c0_33 = arith.constant 0 : index
    %23 = vector.load %arg31[%c0_31, %c0_32, %c0_33] : memref<2x2x32xf32, #tpu.memory_space<vmem>>, vector<2x2x32xf32>
    tpu.vector_store %arg31[%c0_31, %c0_32, %c0_33], %22 {strides = array<i32>} : memref<2x2x32xf32, #tpu.memory_space<vmem>>, vector<2x2x32xf32>,
    return
  }
}

module attributes {stable_mosaic.version = 11 : i64} {
  func.func @kernel(%arg0: memref<16x16xf32, #tpu.memory_space<vmem>>, %arg1: memref<16x32xf32, #tpu.memory_space<vmem>>, %arg2: memref<16x32xf32, #tpu.memory_space<vmem>>, %arg3: memref<16x32xf32, #tpu.memory_space<vmem>>, %arg4: memref<32x32xf32, #tpu.memory_space<vmem>>, %arg5: memref<32x32xf32, #tpu.memory_space<vmem>>, %arg6: memref<32x32xf32, #tpu.memory_space<vmem>>, %arg7: memref<1x32xf32, #tpu.memory_space<vmem>>, %arg8: memref<1x32xf32, #tpu.memory_space<vmem>>, %arg9: memref<1x32xf32, #tpu.memory_space<vmem>>, %arg10: memref<1x32xf32, #tpu.memory_space<vmem>>, %arg11: memref<1x32xf32, #tpu.memory_space<vmem>>, %arg12: memref<1x32xf32, #tpu.memory_space<vmem>>, %arg13: memref<32x32xf32, #tpu.memory_space<vmem>>, %arg14: memref<32x32xf32, #tpu.memory_space<vmem>>, %arg15: memref<32x32xf32, #tpu.memory_space<vmem>>, %arg16: memref<32x32xf32, #tpu.memory_space<vmem>>, %arg17: memref<32x32xf32, #tpu.memory_space<vmem>>, %arg18: memref<32x32xf32, #tpu.memory_space<vmem>>, %arg19: memref<1x32xf32, #tpu.memory_space<vmem>>, %arg20: memref<1x32xf32, #tpu.memory_space<vmem>>, %arg21: memref<1x32xf32, #tpu.memory_space<vmem>>, %arg22: memref<1x32xf32, #tpu.memory_space<vmem>>, %arg23: memref<1x32xf32, #tpu.memory_space<vmem>>, %arg24: memref<1x32xf32, #tpu.memory_space<vmem>>, %arg25: memref<16x32xf32, #tpu.memory_space<vmem>>, %arg26: memref<2x2x32xf32, #tpu.memory_space<vmem>>, %arg27: memref<16x32xf32, #tpu.memory_space<vmem>>, %arg28: memref<2x32xf32, #tpu.memory_space<vmem>>, %arg29: memref<16x32xf32, #tpu.memory_space<vmem>>, %arg30: memref<16x32xf32, #tpu.memory_space<vmem>>, %arg31: memref<16x32xf32, #tpu.memory_space<vmem>>) attributes {dimension_semantics = [], scalar_prefetch = 0 : i64, scratch_operands = 5 : i64, tpu.core_type = #tpu.core_type<tc>} {
    %c0 = arith.constant 0 : index
    %c0_0 = arith.constant 0 : index
    %0 = vector.load %arg0[%c0, %c0_0] : memref<16x16xf32, #tpu.memory_space<vmem>>, vector<16x16xf32>
    %c0_1 = arith.constant 0 : index
    %c0_2 = arith.constant 0 : index
    %1 = vector.load %arg1[%c0_1, %c0_2] : memref<16x32xf32, #tpu.memory_space<vmem>>, vector<16x32xf32>
    %cst = arith.constant dense<0.000000e+00> : vector<16x32xf32>
    %2 = tpu.matmul %0, %1, %cst {dimension_numbers = #tpu.dot_dimension_numbers<[1], [0], [0], [1], [0, 0, 1, 1], [], []>} : vector<16x16xf32>, vector<16x32xf32>, vector<16x32xf32> -> vector<16x32xf32>
    %c0_3 = arith.constant 0 : index
    %c0_4 = arith.constant 0 : index
    %3 = vector.load %arg7[%c0_3, %c0_4] : memref<1x32xf32, #tpu.memory_space<vmem>>, vector<1x32xf32>
    %4 = vector.broadcast %3 : vector<1x32xf32> to vector<16x32xf32>
    %5 = arith.addf %2, %4 : vector<16x32xf32>
    %c0_5 = arith.constant 0 : index
    %c0_6 = arith.constant 0 : index
    %6 = vector.load %arg29[%c0_5, %c0_6] : memref<16x32xf32, #tpu.memory_space<vmem>>, vector<16x32xf32>
    tpu.vector_store %arg29[%c0_5, %c0_6], %5 {strides = array<i32>} : memref<16x32xf32, #tpu.memory_space<vmem>>, vector<16x32xf32>,
    %c0_7 = arith.constant 0 : index
    %c0_8 = arith.constant 0 : index
    %7 = vector.load %arg2[%c0_7, %c0_8] : memref<16x32xf32, #tpu.memory_space<vmem>>, vector<16x32xf32>
    %cst_9 = arith.constant dense<0.000000e+00> : vector<16x32xf32>
    %8 = tpu.matmul %0, %7, %cst_9 {dimension_numbers = #tpu.dot_dimension_numbers<[1], [0], [0], [1], [0, 0, 1, 1], [], []>} : vector<16x16xf32>, vector<16x32xf32>, vector<16x32xf32> -> vector<16x32xf32>
    %c0_10 = arith.constant 0 : index
    %c0_11 = arith.constant 0 : index
    %9 = vector.load %arg8[%c0_10, %c0_11] : memref<1x32xf32, #tpu.memory_space<vmem>>, vector<1x32xf32>
    %10 = vector.broadcast %9 : vector<1x32xf32> to vector<16x32xf32>
    %11 = arith.addf %8, %10 : vector<16x32xf32>
    %c0_12 = arith.constant 0 : index
    %c0_13 = arith.constant 0 : index
    %12 = vector.load %arg30[%c0_12, %c0_13] : memref<16x32xf32, #tpu.memory_space<vmem>>, vector<16x32xf32>
    tpu.vector_store %arg30[%c0_12, %c0_13], %11 {strides = array<i32>} : memref<16x32xf32, #tpu.memory_space<vmem>>, vector<16x32xf32>,
    %c0_14 = arith.constant 0 : index
    %c0_15 = arith.constant 0 : index
    %13 = vector.load %arg3[%c0_14, %c0_15] : memref<16x32xf32, #tpu.memory_space<vmem>>, vector<16x32xf32>
    %cst_16 = arith.constant dense<0.000000e+00> : vector<16x32xf32>
    %14 = tpu.matmul %0, %13, %cst_16 {dimension_numbers = #tpu.dot_dimension_numbers<[1], [0], [0], [1], [0, 0, 1, 1], [], []>} : vector<16x16xf32>, vector<16x32xf32>, vector<16x32xf32> -> vector<16x32xf32>
    %c0_17 = arith.constant 0 : index
    %c0_18 = arith.constant 0 : index
    %15 = vector.load %arg9[%c0_17, %c0_18] : memref<1x32xf32, #tpu.memory_space<vmem>>, vector<1x32xf32>
    %16 = vector.broadcast %15 : vector<1x32xf32> to vector<16x32xf32>
    %17 = arith.addf %14, %16 : vector<16x32xf32>
    %c0_19 = arith.constant 0 : index
    %c0_20 = arith.constant 0 : index
    %18 = vector.load %arg31[%c0_19, %c0_20] : memref<16x32xf32, #tpu.memory_space<vmem>>, vector<16x32xf32>
    tpu.vector_store %arg31[%c0_19, %c0_20], %17 {strides = array<i32>} : memref<16x32xf32, #tpu.memory_space<vmem>>, vector<16x32xf32>,
    %cst_21 = arith.constant 0.000000e+00 : f32
    %19 = vector.broadcast %cst_21 : f32 to vector<2x32xf32>
    %c0_22 = arith.constant 0 : index
    %c0_23 = arith.constant 0 : index
    %20 = vector.load %arg28[%c0_22, %c0_23] : memref<2x32xf32, #tpu.memory_space<vmem>>, vector<2x32xf32>
    tpu.vector_store %arg28[%c0_22, %c0_23], %19 {strides = array<i32>} : memref<2x32xf32, #tpu.memory_space<vmem>>, vector<2x32xf32>,
    %c0_i32 = arith.constant 0 : i32
    %c8_i32 = arith.constant 8 : i32
    %21 = arith.addi %c0_i32, %c8_i32 : i32
    %c1_i32 = arith.constant 1 : i32
    scf.for %arg32 = %c0_i32 to %21 step %c1_i32  : i32 {
      %c2_i32 = arith.constant 2 : i32
      %52 = arith.muli %arg32, %c2_i32 : i32
      %c0_64 = arith.constant 0 : index
      %c0_65 = arith.constant 0 : index
      %53 = vector.load %arg28[%c0_64, %c0_65] : memref<2x32xf32, #tpu.memory_space<vmem>>, vector<2x32xf32>
      %c0_66 = arith.constant 0 : index
      %c0_67 = arith.constant 0 : index
      %54 = vector.load %arg4[%c0_66, %c0_67] : memref<32x32xf32, #tpu.memory_space<vmem>>, vector<32x32xf32>
      %cst_68 = arith.constant dense<0.000000e+00> : vector<2x32xf32>
      %55 = tpu.matmul %53, %54, %cst_68 {dimension_numbers = #tpu.dot_dimension_numbers<[1], [0], [0], [1], [0, 0, 1, 1], [], []>} : vector<2x32xf32>, vector<32x32xf32>, vector<2x32xf32> -> vector<2x32xf32>
      %c0_69 = arith.constant 0 : index
      %c0_70 = arith.constant 0 : index
      %56 = vector.load %arg10[%c0_69, %c0_70] : memref<1x32xf32, #tpu.memory_space<vmem>>, vector<1x32xf32>
      %57 = vector.broadcast %56 : vector<1x32xf32> to vector<2x32xf32>
      %58 = arith.addf %55, %57 : vector<2x32xf32>
      %c0_71 = arith.constant 0 : index
      %c0_72 = arith.constant 0 : index
      %59 = vector.load %arg5[%c0_71, %c0_72] : memref<32x32xf32, #tpu.memory_space<vmem>>, vector<32x32xf32>
      %cst_73 = arith.constant dense<0.000000e+00> : vector<2x32xf32>
      %60 = tpu.matmul %53, %59, %cst_73 {dimension_numbers = #tpu.dot_dimension_numbers<[1], [0], [0], [1], [0, 0, 1, 1], [], []>} : vector<2x32xf32>, vector<32x32xf32>, vector<2x32xf32> -> vector<2x32xf32>
      %c0_74 = arith.constant 0 : index
      %c0_75 = arith.constant 0 : index
      %61 = vector.load %arg11[%c0_74, %c0_75] : memref<1x32xf32, #tpu.memory_space<vmem>>, vector<1x32xf32>
      %62 = vector.broadcast %61 : vector<1x32xf32> to vector<2x32xf32>
      %63 = arith.addf %60, %62 : vector<2x32xf32>
      %c0_76 = arith.constant 0 : index
      %c0_77 = arith.constant 0 : index
      %64 = vector.load %arg6[%c0_76, %c0_77] : memref<32x32xf32, #tpu.memory_space<vmem>>, vector<32x32xf32>
      %cst_78 = arith.constant dense<0.000000e+00> : vector<2x32xf32>
      %65 = tpu.matmul %53, %64, %cst_78 {dimension_numbers = #tpu.dot_dimension_numbers<[1], [0], [0], [1], [0, 0, 1, 1], [], []>} : vector<2x32xf32>, vector<32x32xf32>, vector<2x32xf32> -> vector<2x32xf32>
      %c0_79 = arith.constant 0 : index
      %c0_80 = arith.constant 0 : index
      %66 = vector.load %arg12[%c0_79, %c0_80] : memref<1x32xf32, #tpu.memory_space<vmem>>, vector<1x32xf32>
      %67 = vector.broadcast %66 : vector<1x32xf32> to vector<2x32xf32>
      %68 = arith.addf %65, %67 : vector<2x32xf32>
      %69 = arith.index_cast %52 : i32 to index
      %c0_81 = arith.constant 0 : index
      %70 = vector.load %arg29[%69, %c0_81] : memref<16x32xf32, #tpu.memory_space<vmem>>, vector<2x32xf32>
      %71 = arith.addf %70, %58 : vector<2x32xf32>
      %72 = arith.negf %71 : vector<2x32xf32>
      %73 = math.exp %72 : vector<2x32xf32>
      %cst_82 = arith.constant 1.000000e+00 : f32
      %74 = vector.broadcast %cst_82 : f32 to vector<2x32xf32>
      %75 = arith.addf %74, %73 : vector<2x32xf32>
      %76 = arith.divf %74, %75 : vector<2x32xf32>
      %77 = arith.index_cast %52 : i32 to index
      %c0_83 = arith.constant 0 : index
      %78 = vector.load %arg30[%77, %c0_83] : memref<16x32xf32, #tpu.memory_space<vmem>>, vector<2x32xf32>
      %79 = arith.addf %78, %63 : vector<2x32xf32>
      %80 = arith.negf %79 : vector<2x32xf32>
      %81 = math.exp %80 : vector<2x32xf32>
      %cst_84 = arith.constant 1.000000e+00 : f32
      %82 = vector.broadcast %cst_84 : f32 to vector<2x32xf32>
      %83 = arith.addf %82, %81 : vector<2x32xf32>
      %84 = arith.divf %82, %83 : vector<2x32xf32>
      %85 = arith.index_cast %52 : i32 to index
      %c0_85 = arith.constant 0 : index
      %86 = vector.load %arg31[%85, %c0_85] : memref<16x32xf32, #tpu.memory_space<vmem>>, vector<2x32xf32>
      %87 = arith.mulf %76, %68 : vector<2x32xf32>
      %88 = arith.addf %86, %87 : vector<2x32xf32>
      %89 = math.tanh %88 : vector<2x32xf32>
      %cst_86 = arith.constant 1.000000e+00 : f32
      %90 = vector.broadcast %cst_86 : f32 to vector<2x32xf32>
      %91 = arith.subf %90, %84 : vector<2x32xf32>
      %92 = arith.mulf %91, %89 : vector<2x32xf32>
      %93 = arith.mulf %84, %53 : vector<2x32xf32>
      %94 = arith.addf %92, %93 : vector<2x32xf32>
      %c0_87 = arith.constant 0 : index
      %c0_88 = arith.constant 0 : index
      %95 = vector.load %arg28[%c0_87, %c0_88] : memref<2x32xf32, #tpu.memory_space<vmem>>, vector<2x32xf32>
      tpu.vector_store %arg28[%c0_87, %c0_88], %94 {strides = array<i32>} : memref<2x32xf32, #tpu.memory_space<vmem>>, vector<2x32xf32>,
      %96 = arith.index_cast %52 : i32 to index
      %c0_89 = arith.constant 0 : index
      %97 = vector.load %arg27[%96, %c0_89] : memref<16x32xf32, #tpu.memory_space<vmem>>, vector<2x32xf32>
      tpu.vector_store %arg27[%96, %c0_89], %94 {strides = array<i32>} : memref<16x32xf32, #tpu.memory_space<vmem>>, vector<2x32xf32>,
    }
    %c8_i32_24 = arith.constant 8 : i32
    %c0_25 = arith.constant 0 : index
    %c0_26 = arith.constant 0 : index
    %22 = vector.load %arg28[%c0_25, %c0_26] : memref<2x32xf32, #tpu.memory_space<vmem>>, vector<2x32xf32>
    %c0_27 = arith.constant 0 : index
    %c0_28 = arith.constant 0 : index
    %c0_29 = arith.constant 0 : index
    %23 = vector.load %arg26[%c0_27, %c0_28, %c0_29] : memref<2x2x32xf32, #tpu.memory_space<vmem>>, vector<1x2x32xf32>
    %24 = vector.shape_cast %23 : vector<1x2x32xf32> to vector<2x32xf32>
    %25 = vector.shape_cast %22 : vector<2x32xf32> to vector<1x2x32xf32>
    tpu.vector_store %arg26[%c0_27, %c0_28, %c0_29], %25 {strides = array<i32>} : memref<2x2x32xf32, #tpu.memory_space<vmem>>, vector<1x2x32xf32>,
    %c0_30 = arith.constant 0 : index
    %c0_31 = arith.constant 0 : index
    %26 = vector.load %arg27[%c0_30, %c0_31] : memref<16x32xf32, #tpu.memory_space<vmem>>, vector<16x32xf32>
    %c0_32 = arith.constant 0 : index
    %c0_33 = arith.constant 0 : index
    %27 = vector.load %arg13[%c0_32, %c0_33] : memref<32x32xf32, #tpu.memory_space<vmem>>, vector<32x32xf32>
    %cst_34 = arith.constant dense<0.000000e+00> : vector<16x32xf32>
    %28 = tpu.matmul %26, %27, %cst_34 {dimension_numbers = #tpu.dot_dimension_numbers<[1], [0], [0], [1], [0, 0, 1, 1], [], []>} : vector<16x32xf32>, vector<32x32xf32>, vector<16x32xf32> -> vector<16x32xf32>
    %c0_35 = arith.constant 0 : index
    %c0_36 = arith.constant 0 : index
    %29 = vector.load %arg19[%c0_35, %c0_36] : memref<1x32xf32, #tpu.memory_space<vmem>>, vector<1x32xf32>
    %30 = vector.broadcast %29 : vector<1x32xf32> to vector<16x32xf32>
    %31 = arith.addf %28, %30 : vector<16x32xf32>
    %c0_37 = arith.constant 0 : index
    %c0_38 = arith.constant 0 : index
    %32 = vector.load %arg29[%c0_37, %c0_38] : memref<16x32xf32, #tpu.memory_space<vmem>>, vector<16x32xf32>
    tpu.vector_store %arg29[%c0_37, %c0_38], %31 {strides = array<i32>} : memref<16x32xf32, #tpu.memory_space<vmem>>, vector<16x32xf32>,
    %c0_39 = arith.constant 0 : index
    %c0_40 = arith.constant 0 : index
    %33 = vector.load %arg14[%c0_39, %c0_40] : memref<32x32xf32, #tpu.memory_space<vmem>>, vector<32x32xf32>
    %cst_41 = arith.constant dense<0.000000e+00> : vector<16x32xf32>
    %34 = tpu.matmul %26, %33, %cst_41 {dimension_numbers = #tpu.dot_dimension_numbers<[1], [0], [0], [1], [0, 0, 1, 1], [], []>} : vector<16x32xf32>, vector<32x32xf32>, vector<16x32xf32> -> vector<16x32xf32>
    %c0_42 = arith.constant 0 : index
    %c0_43 = arith.constant 0 : index
    %35 = vector.load %arg20[%c0_42, %c0_43] : memref<1x32xf32, #tpu.memory_space<vmem>>, vector<1x32xf32>
    %36 = vector.broadcast %35 : vector<1x32xf32> to vector<16x32xf32>
    %37 = arith.addf %34, %36 : vector<16x32xf32>
    %c0_44 = arith.constant 0 : index
    %c0_45 = arith.constant 0 : index
    %38 = vector.load %arg30[%c0_44, %c0_45] : memref<16x32xf32, #tpu.memory_space<vmem>>, vector<16x32xf32>
    tpu.vector_store %arg30[%c0_44, %c0_45], %37 {strides = array<i32>} : memref<16x32xf32, #tpu.memory_space<vmem>>, vector<16x32xf32>,
    %c0_46 = arith.constant 0 : index
    %c0_47 = arith.constant 0 : index
    %39 = vector.load %arg15[%c0_46, %c0_47] : memref<32x32xf32, #tpu.memory_space<vmem>>, vector<32x32xf32>
    %cst_48 = arith.constant dense<0.000000e+00> : vector<16x32xf32>
    %40 = tpu.matmul %26, %39, %cst_48 {dimension_numbers = #tpu.dot_dimension_numbers<[1], [0], [0], [1], [0, 0, 1, 1], [], []>} : vector<16x32xf32>, vector<32x32xf32>, vector<16x32xf32> -> vector<16x32xf32>
    %c0_49 = arith.constant 0 : index
    %c0_50 = arith.constant 0 : index
    %41 = vector.load %arg21[%c0_49, %c0_50] : memref<1x32xf32, #tpu.memory_space<vmem>>, vector<1x32xf32>
    %42 = vector.broadcast %41 : vector<1x32xf32> to vector<16x32xf32>
    %43 = arith.addf %40, %42 : vector<16x32xf32>
    %c0_51 = arith.constant 0 : index
    %c0_52 = arith.constant 0 : index
    %44 = vector.load %arg31[%c0_51, %c0_52] : memref<16x32xf32, #tpu.memory_space<vmem>>, vector<16x32xf32>
    tpu.vector_store %arg31[%c0_51, %c0_52], %43 {strides = array<i32>} : memref<16x32xf32, #tpu.memory_space<vmem>>, vector<16x32xf32>,
    %cst_53 = arith.constant 0.000000e+00 : f32
    %45 = vector.broadcast %cst_53 : f32 to vector<2x32xf32>
    %c0_54 = arith.constant 0 : index
    %c0_55 = arith.constant 0 : index
    %46 = vector.load %arg28[%c0_54, %c0_55] : memref<2x32xf32, #tpu.memory_space<vmem>>, vector<2x32xf32>
    tpu.vector_store %arg28[%c0_54, %c0_55], %45 {strides = array<i32>} : memref<2x32xf32, #tpu.memory_space<vmem>>, vector<2x32xf32>,
    %c0_i32_56 = arith.constant 0 : i32
    %c8_i32_57 = arith.constant 8 : i32
    %47 = arith.addi %c0_i32_56, %c8_i32_57 : i32
    %c1_i32_58 = arith.constant 1 : i32
    scf.for %arg32 = %c0_i32_56 to %47 step %c1_i32_58  : i32 {
      %c2_i32 = arith.constant 2 : i32
      %52 = arith.muli %arg32, %c2_i32 : i32
      %c0_64 = arith.constant 0 : index
      %c0_65 = arith.constant 0 : index
      %53 = vector.load %arg28[%c0_64, %c0_65] : memref<2x32xf32, #tpu.memory_space<vmem>>, vector<2x32xf32>
      %c0_66 = arith.constant 0 : index
      %c0_67 = arith.constant 0 : index
      %54 = vector.load %arg16[%c0_66, %c0_67] : memref<32x32xf32, #tpu.memory_space<vmem>>, vector<32x32xf32>
      %cst_68 = arith.constant dense<0.000000e+00> : vector<2x32xf32>
      %55 = tpu.matmul %53, %54, %cst_68 {dimension_numbers = #tpu.dot_dimension_numbers<[1], [0], [0], [1], [0, 0, 1, 1], [], []>} : vector<2x32xf32>, vector<32x32xf32>, vector<2x32xf32> -> vector<2x32xf32>
      %c0_69 = arith.constant 0 : index
      %c0_70 = arith.constant 0 : index
      %56 = vector.load %arg22[%c0_69, %c0_70] : memref<1x32xf32, #tpu.memory_space<vmem>>, vector<1x32xf32>
      %57 = vector.broadcast %56 : vector<1x32xf32> to vector<2x32xf32>
      %58 = arith.addf %55, %57 : vector<2x32xf32>
      %c0_71 = arith.constant 0 : index
      %c0_72 = arith.constant 0 : index
      %59 = vector.load %arg17[%c0_71, %c0_72] : memref<32x32xf32, #tpu.memory_space<vmem>>, vector<32x32xf32>
      %cst_73 = arith.constant dense<0.000000e+00> : vector<2x32xf32>
      %60 = tpu.matmul %53, %59, %cst_73 {dimension_numbers = #tpu.dot_dimension_numbers<[1], [0], [0], [1], [0, 0, 1, 1], [], []>} : vector<2x32xf32>, vector<32x32xf32>, vector<2x32xf32> -> vector<2x32xf32>
      %c0_74 = arith.constant 0 : index
      %c0_75 = arith.constant 0 : index
      %61 = vector.load %arg23[%c0_74, %c0_75] : memref<1x32xf32, #tpu.memory_space<vmem>>, vector<1x32xf32>
      %62 = vector.broadcast %61 : vector<1x32xf32> to vector<2x32xf32>
      %63 = arith.addf %60, %62 : vector<2x32xf32>
      %c0_76 = arith.constant 0 : index
      %c0_77 = arith.constant 0 : index
      %64 = vector.load %arg18[%c0_76, %c0_77] : memref<32x32xf32, #tpu.memory_space<vmem>>, vector<32x32xf32>
      %cst_78 = arith.constant dense<0.000000e+00> : vector<2x32xf32>
      %65 = tpu.matmul %53, %64, %cst_78 {dimension_numbers = #tpu.dot_dimension_numbers<[1], [0], [0], [1], [0, 0, 1, 1], [], []>} : vector<2x32xf32>, vector<32x32xf32>, vector<2x32xf32> -> vector<2x32xf32>
      %c0_79 = arith.constant 0 : index
      %c0_80 = arith.constant 0 : index
      %66 = vector.load %arg24[%c0_79, %c0_80] : memref<1x32xf32, #tpu.memory_space<vmem>>, vector<1x32xf32>
      %67 = vector.broadcast %66 : vector<1x32xf32> to vector<2x32xf32>
      %68 = arith.addf %65, %67 : vector<2x32xf32>
      %69 = arith.index_cast %52 : i32 to index
      %c0_81 = arith.constant 0 : index
      %70 = vector.load %arg29[%69, %c0_81] : memref<16x32xf32, #tpu.memory_space<vmem>>, vector<2x32xf32>
      %71 = arith.addf %70, %58 : vector<2x32xf32>
      %72 = arith.negf %71 : vector<2x32xf32>
      %73 = math.exp %72 : vector<2x32xf32>
      %cst_82 = arith.constant 1.000000e+00 : f32
      %74 = vector.broadcast %cst_82 : f32 to vector<2x32xf32>
      %75 = arith.addf %74, %73 : vector<2x32xf32>
      %76 = arith.divf %74, %75 : vector<2x32xf32>
      %77 = arith.index_cast %52 : i32 to index
      %c0_83 = arith.constant 0 : index
      %78 = vector.load %arg30[%77, %c0_83] : memref<16x32xf32, #tpu.memory_space<vmem>>, vector<2x32xf32>
      %79 = arith.addf %78, %63 : vector<2x32xf32>
      %80 = arith.negf %79 : vector<2x32xf32>
      %81 = math.exp %80 : vector<2x32xf32>
      %cst_84 = arith.constant 1.000000e+00 : f32
      %82 = vector.broadcast %cst_84 : f32 to vector<2x32xf32>
      %83 = arith.addf %82, %81 : vector<2x32xf32>
      %84 = arith.divf %82, %83 : vector<2x32xf32>
      %85 = arith.index_cast %52 : i32 to index
      %c0_85 = arith.constant 0 : index
      %86 = vector.load %arg31[%85, %c0_85] : memref<16x32xf32, #tpu.memory_space<vmem>>, vector<2x32xf32>
      %87 = arith.mulf %76, %68 : vector<2x32xf32>
      %88 = arith.addf %86, %87 : vector<2x32xf32>
      %89 = math.tanh %88 : vector<2x32xf32>
      %cst_86 = arith.constant 1.000000e+00 : f32
      %90 = vector.broadcast %cst_86 : f32 to vector<2x32xf32>
      %91 = arith.subf %90, %84 : vector<2x32xf32>
      %92 = arith.mulf %91, %89 : vector<2x32xf32>
      %93 = arith.mulf %84, %53 : vector<2x32xf32>
      %94 = arith.addf %92, %93 : vector<2x32xf32>
      %c0_87 = arith.constant 0 : index
      %c0_88 = arith.constant 0 : index
      %95 = vector.load %arg28[%c0_87, %c0_88] : memref<2x32xf32, #tpu.memory_space<vmem>>, vector<2x32xf32>
      tpu.vector_store %arg28[%c0_87, %c0_88], %94 {strides = array<i32>} : memref<2x32xf32, #tpu.memory_space<vmem>>, vector<2x32xf32>,
      %96 = arith.index_cast %52 : i32 to index
      %c0_89 = arith.constant 0 : index
      %97 = vector.load %arg25[%96, %c0_89] : memref<16x32xf32, #tpu.memory_space<vmem>>, vector<2x32xf32>
      tpu.vector_store %arg25[%96, %c0_89], %94 {strides = array<i32>} : memref<16x32xf32, #tpu.memory_space<vmem>>, vector<2x32xf32>,
    }
    %c8_i32_59 = arith.constant 8 : i32
    %c0_60 = arith.constant 0 : index
    %c0_61 = arith.constant 0 : index
    %48 = vector.load %arg28[%c0_60, %c0_61] : memref<2x32xf32, #tpu.memory_space<vmem>>, vector<2x32xf32>
    %c1 = arith.constant 1 : index
    %c0_62 = arith.constant 0 : index
    %c0_63 = arith.constant 0 : index
    %49 = vector.load %arg26[%c1, %c0_62, %c0_63] : memref<2x2x32xf32, #tpu.memory_space<vmem>>, vector<1x2x32xf32>
    %50 = vector.shape_cast %49 : vector<1x2x32xf32> to vector<2x32xf32>
    %51 = vector.shape_cast %48 : vector<2x32xf32> to vector<1x2x32xf32>
    tpu.vector_store %arg26[%c1, %c0_62, %c0_63], %51 {strides = array<i32>} : memref<2x2x32xf32, #tpu.memory_space<vmem>>, vector<1x2x32xf32>,
    return
  }
}

</mosaic_0001>

<bundles_post_ra>
// kernel: seq2seq_forward.5
= control target key start
LH: loop header
LB: loop body
LE: loop exit
PB: predicated region body
PF: predicated region fallthrough
CT: control target
= control target key end

     0   :  { %vm28_vm0 = vcmask 261120   ;;  %s243_s0 = inlined_call_operand.vmem [shape: f32[16,32], index: 0, kind: input, shape index: {}]   ;;  %s244_s1 = inlined_call_operand.vmem [shape: f32[32,32], index: 1, kind: input, shape index: {}]   ;;  %s245_s2 = inlined_call_operand.vmem [shape: f32[1,32], index: 2, kind: input, shape index: {}]   ;;  %s246_s3 = inlined_call_operand.hbm [shape: f32[16,32], index: 3, kind: output, shape index: {}]  }
   0x1   :  { %v17_v0 = vld [vmem:[%s244_s1] sm:$0xff]  ;;  %v18_v1 = vld [vmem:[%s244_s1 + $0x8] sm:$0xff]  ;;  %v19_v2 = vld [vmem:[%s244_s1 + $0x10] sm:$0xff] }
   0x2   :  { %v148_v3 = vpack.c.bf16 %v18_v1, %v17_v0  ;;  %v20_v4 = vld [vmem:[%s244_s1 + $0x18] sm:$0xff]  ;;  %v15_v5 = vld [vmem:[%s243_s0] sm:$0xff] }
   0x3   :  { %v152_v6 = vpack.c.bf16 %v20_v4, %v19_v2  ;;  %145 = vmatprep.mubr.msk.f32.mxu0 %vm28_vm0, %v15_v5 }
   0x4   :  { %8 = vsyncpa [#allocation3], 0  ;;  %149 = vmatprep.subr.bf16.mxu0 %v148_v3  ;;  %v16_v7 = vld [vmem:[%s243_s0 + $0x8] sm:$0xff]  ;;  %v128_v8 = vld [vmem:[%s245_s2] ss:$0 sm:$0xff]  ;;  %s183_s25 = smov [#allocation2]  }
   0x5   :  { %151 = vmatpush3.bf16.msra.mxu0 %v148_v3  ;;  %s117_s26 = sshll.u32 %s183_s25, 4  ;;  %s118_s26 = int_to_ptr.vmem [resolvable:$true] %s117_s26 }
   0x6   :  { %153 = vmatprep.subr.bf16.mxu0 %v152_v6  ;;  %s159_s27 = scalar_lea.vmem %s118_s26, 256  ;;  %p164_p1 = scmp.lt.s32.totalorder %s118_s26, %s118_s26 }
   0x7   :  { %p160_p0 = scmp.ne.s32.totalorder %s118_s26, %s159_s27  ;;  %p165_p2 = scmp.lt.s32.totalorder %s159_s27, %s159_s27 }
   0x9   :  { %155 = vmatpush3.bf16.msra.mxu0 %v152_v6  ;;  %p166_p3 = por %p165_p2, %p164_p1 }
   0xb   :  { %p167_p4 = pnand %p166_p3, %p160_p0 }
   0xc   :  { %146 = vmatmul.mubr.msk.f32.vlgmr.msra.gmra.mrb[0].mxu0 %vm28_vm0, %v16_v7 }
  0xdf   :  { %v147_v9 = vpop.f32.mrb[0].mxu0 }
  0xe0   :  { %v107_v10 = vadd.f32 %v147_v9, %v128_v8  ;;  %v101_v11 = vpop.f32.mrb[1].mxu0 }
  0xe1   :  { %v102_v12 = vadd.f32 %v128_v8, %v101_v11 }
  0xe2   :  { %111 = vst.msk [vmem:[#allocation2 + $0x8] sm:$0xff] %vm28_vm0, %v107_v10 }
  0xe3   :  { %110 = vst.msk [vmem:[#allocation2] sm:$0xff] %vm28_vm0, %v102_v12 }
  0xe4   :  { %170 = shalt.err (!%p167_p4)
}
  0xe5   :  { %s171_s28 = scalar_lea.hbm %s246_s3, 256 }
  0xe6   :  { %p172_p5 = scmp.ne.s32.totalorder %s246_s3, %s171_s28  ;;  %p175_p6 = scmp.lt.u32.totalorder %s171_s28, %s246_s3 }
  0xe8   :  { %p177_p7 = pnand %p175_p6, %p172_p5 }
  0xea   :  { %180 = shalt.err (!%p177_p7)
}
  0xeb   :  { %s184_s6 = smov 128   ;;  %s185_s7 = smov 8  }
  0xec   :  { %123 = dma.vmem_to_hbm [thread:$0]  %s118_s26, 256, %s246_s3, [#allocation3], %s184_s6, %s184_s6, %s185_s7  }
  0xed   :  { %181 = dma.done.wait [#allocation3], 256  }
  0xee   :  { %182 = vsyncadd [#allocation3], 4294967040 }
  0xef   :  { %127 = vsyncpa [#allocation3], 1 }

// kernel: seq2seq_forward.3
= control target key start
LH: loop header
LB: loop body
LE: loop exit
PB: predicated region body
PF: predicated region fallthrough
CT: control target
= control target key end

     0   :  { %s2023_s0 = inlined_call_operand.vmem [shape: f32[16,16], index: 0, kind: input, shape index: {}]   ;;  %s2024_s1 = inlined_call_operand.vmem [shape: f32[16,32], index: 1, kind: input, shape index: {}]   ;;  %s2025_s2 = inlined_call_operand.vmem [shape: f32[16,32], index: 2, kind: input, shape index: {}]   ;;  %s2026_s3 = inlined_call_operand.vmem [shape: f32[16,32], index: 3, kind: input, shape index: {}]   ;;  %s2027_s4 = inlined_call_operand.vmem [shape: f32[32,32], index: 4, kind: input, shape index: {}]   ;;  %s2028_s5 = inlined_call_operand.vmem [shape: f32[32,32], index: 5, kind: input, shape index: {}]   ;;  %s2029_s6 = inlined_call_operand.vmem [shape: f32[32,32], index: 6, kind: input, shape index: {}]   ;;  %s2030_s7 = inlined_call_operand.vmem [shape: f32[1,32], index: 7, kind: input, shape index: {}]   ;;  %s2031_s8 = inlined_call_operand.vmem [shape: f32[1,32], index: 8, kind: input, shape index: {}]   ;;  %s2032_s9 = inlined_call_operand.vmem [shape: f32[1,32], index: 9, kind: input, shape index: {}]   ;;  %s2033_s10 = inlined_call_operand.vmem [shape: f32[1,32], index: 10, kind: input, shape index: {}]   ;;  %s2034_s11 = inlined_call_operand.vmem [shape: f32[1,32], index: 11, kind: input, shape index: {}]   ;;  %s2035_s12 = inlined_call_operand.vmem [shape: f32[1,32], index: 12, kind: input, shape index: {}]   ;;  %s2036_s13 = inlined_call_operand.vmem [shape: f32[32,32], index: 13, kind: input, shape index: {}]   ;;  %s2037_s14 = inlined_call_operand.vmem [shape: f32[32,32], index: 14, kind: input, shape index: {}]   ;;  %s2038_s15 = inlined_call_operand.vmem [shape: f32[32,32], index: 15, kind: input, shape index: {}]   ;;  %s2039_s16 = inlined_call_operand.vmem [shape: f32[32,32], index: 16, kind: input, shape index: {}]   ;;  %s2040_s17 = inlined_call_operand.vmem [shape: f32[32,32], index: 17, kind: input, shape index: {}]   ;;  %s2041_s18 = inlined_call_operand.vmem [shape: f32[32,32], index: 18, kind: input, shape index: {}]   ;;  %s2042_s19 = inlined_call_operand.vmem [shape: f32[1,32], index: 19, kind: input, shape index: {}]   ;;  %s2043_s20 = inlined_call_operand.vmem [shape: f32[1,32], index: 20, kind: input, shape index: {}]   ;;  %s2044_s21 = inlined_call_operand.vmem [shape: f32[1,32], index: 21, kind: input, shape index: {}]   ;;  %s2045_s22 = inlined_call_operand.vmem [shape: f32[1,32], index: 22, kind: input, shape index: {}]   ;;  %s2046_s23 = inlined_call_operand.vmem [shape: f32[1,32], index: 23, kind: input, shape index: {}]   ;;  %s2047_s24 = inlined_call_operand.hbm [shape: f32[1,32], index: 24, kind: input, shape index: {}]   ;;  %s2048_s25 = inlined_call_operand.vmem [shape: f32[16,32], index: 25, kind: output, shape index: {0}]   ;;  %s2049_s26 = inlined_call_operand.vmem [shape: f32[2,2,32], index: 26, kind: output, shape index: {1}]  }
   0x1   :  { %2057 = sst [smem:[#allocation10_spill]] %s2023_s0 }
   0x2   :  { %2058 = sst [smem:[#allocation11_spill]] %s2024_s1 }
   0x3   :  { %2059 = sst [smem:[#allocation12_spill]] %s2025_s2 }
   0x4   :  { %2060 = sst [smem:[#allocation13_spill]] %s2026_s3 }
   0x5   :  { %2061 = sst [smem:[#allocation14_spill]] %s2027_s4 }
   0x6   :  { %2062 = sst [smem:[#allocation15_spill]] %s2028_s5 }
   0x7   :  { %2063 = sst [smem:[#allocation16_spill]] %s2029_s6 }
   0x8   :  { %2064 = sst [smem:[#allocation17_spill]] %s2030_s7 }
   0x9   :  { %2065 = sst [smem:[#allocation18_spill]] %s2031_s8 }
   0xa   :  { %2066 = sst [smem:[#allocation19_spill]] %s2032_s9 }
   0xb   :  { %2067 = sst [smem:[#allocation20_spill]] %s2033_s10 }
   0xc   :  { %32 = vsyncpa [#allocation8], 0  ;;  %s1618_s27 = smov [#allocation7]   ;;  %s1578_s8 = scalar_lea.hbm %s2047_s24, 16 }
   0xd   :  { %s87_s3 = sshll.u32 %s1618_s27, 4  ;;  %p1579_p0 = scmp.ne.s32.totalorder %s2047_s24, %s1578_s8  ;;  %s88_s3 = int_to_ptr.vmem [resolvable:$true] %s87_s3 }
   0xe   :  { %p1582_p1 = scmp.lt.u32.totalorder %s1578_s8, %s2047_s24 }
  0x10   :  { %p1584_p2 = pnand %p1582_p1, %p1579_p0 }
  0x12   :  { %1587 = shalt.err (!%p1584_p2)
}
  0x13   :  { %s1588_s30 = scalar_lea.vmem %s88_s3, 16  ;;  %s1592_s2 = scalar_lea.vmem %s88_s3, 32 }
  0x14   :  { %p1589_p3 = scmp.ne.s32.totalorder %s88_s3, %s1588_s30  ;;  %p1593_p4 = scmp.lt.s32.totalorder %s88_s3, %s88_s3 }
  0x15   :  { %p1594_p5 = scmp.lt.s32.totalorder %s1592_s2, %s1588_s30 }
  0x17   :  { %p1595_p6 = por %p1594_p5, %p1593_p4 }
  0x19   :  { %p1596_p7 = pnand %p1595_p6, %p1589_p3 }
  0x1b   :  { %1599 = shalt.err (!%p1596_p7)
}
  0x1c   :  { %90 = dma.hbm_to_vmem [thread:$0]  %s2047_s24, 16, %s88_s3, [#allocation8]  }
  0x1d   :  { %1608 = dma.done.wait [#allocation8], 16  }
  0x1e   :  { %1609 = vsyncadd [#allocation8], 4294967280  ;;  %vm362_vm0 = vcmask 254976   ;;  %v1619_v0 = vmov 0.0   ;;  %vm105_vm1 = vcmask 130048   ;;  %s2068_s27 = sld [smem:[#allocation11_spill]] }
  0x1f   :  { %363 = vst.msk [vmem:[#allocation3] sm:$0x3] %vm362_vm0, %v1619_v0  ;;  %s2069_s29 = sld [smem:[#allocation10_spill]]  ;;  %s2070_s0 = sld [smem:[#allocation12_spill]]  ;;  %vm187_vm2 = vcmask 261120  }
  0x20   :  { %s2071_s10 = sld [smem:[#allocation13_spill]]  ;;  %s2072_s4 = sld [smem:[#allocation17_spill]] }
  0x21   :  { %s2073_s3 = sld [smem:[#allocation18_spill]]  ;;  %s2074_s30 = sld [smem:[#allocation19_spill]] }
  0x22   :  { %s1820_s2 = smov 0  }
  0x24   :  { %v96_v1 = vld [vmem:[%s2068_s27] sm:$0xff]  ;;  %v97_v2 = vld [vmem:[%s2068_s27 + $0x8] sm:$0xff] }
  0x25   :  { %v94_v3 = vld [vmem:[%s2069_s29] sm:$0xff]  ;;  %v1462_v4 = vpack.c.bf16 %v97_v2, %v96_v1  ;;  %v191_v6 = vld [vmem:[%s2070_s0 + $0x8] sm:$0xff] }
  0x26   :  { %1346 = vmatprep.mubr.msk.f32.mxu0 %vm105_vm1, %v94_v3  ;;  %v190_v5 = vld [vmem:[%s2070_s0] sm:$0xff]  ;;  %1353 = vmatprep.mubr.msk.f32.mxu1 %vm105_vm1, %v94_v3  ;;  %v277_v9 = vld [vmem:[%s2071_s10 + $0x8] sm:$0xff] }
  0x27   :  { %v1466_v7 = vpack.c.bf16 %v191_v6, %v190_v5  ;;  %v276_v8 = vld [vmem:[%s2071_s10] sm:$0xff]  ;;  %1463 = vmatprep.subr.bf16.mxu0 %v1462_v4  ;;  %v95_v11 = vld [vmem:[%s2069_s29 + $0x8] sm:$0xff] }
  0x28   :  { %v1470_v10 = vpack.c.bf16 %v277_v9, %v276_v8  ;;  %1465 = vmatpush3.bf16.msra.mxu0 %v1462_v4  ;;  %v1245_v12 = vld [vmem:[%s2072_s4] ss:$0 sm:$0xff] }
  0x29   :  { %1467 = vmatprep.subr.bf16.mxu1 %v1466_v7  ;;  %v1248_v14 = vld [vmem:[%s2073_s3] ss:$0 sm:$0xff] }
  0x2a   :  { %1471 = vmatprep.subr.bf16.mxu0 %v1470_v10  ;;  %1469 = vmatpush3.bf16.msra.mxu1 %v1466_v7  ;;  %v1251_v19 = vld [vmem:[%s2074_s30] ss:$0 sm:$0xff] }
  0x2b   :  { %1347 = vmatmul.mubr.msk.f32.vlgmr.msra.gmra.mrb[0].mxu0 %vm105_vm1, %v95_v11 }
  0x2c   :  { %1473 = vmatpush3.bf16.msra.mxu0 %v1470_v10  ;;  %1360 = vmatprep.mubr.msk.f32.mxu0 %vm105_vm1, %v94_v3 }
  0x2d   :  { %1354 = vmatmul.mubr.msk.f32.vlgmr.msra.gmra.mrb[0].mxu1 %vm105_vm1, %v95_v11 }
  0x2f   :  { %1361 = vmatmul.mubr.msk.f32.vlgmr.msra.gmra.mrb[2].mxu0 %vm105_vm1, %v95_v11 }
  0xfe   :  { %v1348_v13 = vpop.f32.mrb[0].mxu0 }
  0xff   :  { %v184_v15 = vadd.f32 %v1348_v13, %v1245_v12  ;;  %v178_v16 = vpop.f32.mrb[1].mxu0 }
 0x100   :  { %v179_v17 = vadd.f32 %v1245_v12, %v178_v16  ;;  %v1355_v18 = vpop.f32.mrb[0].mxu1 }
 0x101   :  { %189 = vst.msk [vmem:[#allocation4 + $0x8] sm:$0xff] %vm187_vm2, %v184_v15  ;;  %v271_v20 = vadd.f32 %v1355_v18, %v1248_v14  ;;  %v265_v21 = vpop.f32.mrb[1].mxu1 }
 0x102   :  { %188 = vst.msk [vmem:[#allocation4] sm:$0xff] %vm187_vm2, %v179_v17  ;;  %v1362_v22 = vpop.f32.mrb[2].mxu0  ;;  %v266_v23 = vadd.f32 %v1248_v14, %v265_v21 }
 0x103   :  { %275 = vst.msk [vmem:[#allocation5 + $0x8] sm:$0xff] %vm187_vm2, %v271_v20  ;;  %v357_v24 = vadd.f32 %v1362_v22, %v1251_v19  ;;  %v351_v25 = vpop.f32.mrb[3].mxu0 }
 0x104   :  { %274 = vst.msk [vmem:[#allocation5] sm:$0xff] %vm187_vm2, %v266_v23  ;;  %v352_v26 = vadd.f32 %v1251_v19, %v351_v25 }
 0x105   :  { %361 = vst.msk [vmem:[#allocation6 + $0x8] sm:$0xff] %vm187_vm2, %v357_v24 }
 0x106   :  { %360 = vst.msk [vmem:[#allocation6] sm:$0xff] %vm187_vm2, %v352_v26 }
 0x107 LB: > { %s2075_s6 = sld [smem:[#allocation14_spill]]  ;;  %v1620_v30 = vmov 0.0|0.0   ;;  %vm1621_vm3 = vmmov 0   ;;  %v1622_v33 = vmov 0.0   ;;  %s2076_s3 = sld [smem:[#allocation15_spill]]  ;;  %s1612_s2 = sphi %s1820_s2, %s369_s2  }
 0x108   : > { %1474 = vmatprep.subr.bf16.mxu0 %v1620_v30  ;;  %1371 = vmatprep.mubr.msk.f32.mxu0 %vm1621_vm3, %v1622_v33  ;;  %s2077_s28 = sld [smem:[#allocation16_spill]]  ;;  %v371_v43 = vld [vmem:[#allocation3] sm:$0x3]  ;;  %s1868_s30 = sshll.u32 %s1612_s2, 1  ;;  %v1257_v51 = vld [vmem:[%s2034_s11] ss:$0 sm:$0xff] }
 0x109   : > { %1480 = vmatprep.subr.bf16.mxu1 %v1620_v30  ;;  %1382 = vmatprep.mubr.msk.f32.mxu1 %vm1621_vm3, %v1622_v33  ;;  %s2078_s1 = sld [smem:[#allocation20_spill]]  ;;  %s618_s27 = scalar_lea.vmem [#allocation4], %s1868_s30  ;;  %v1259_v4 = vld [vmem:[%s2035_s12] ss:$0 sm:$0xff] }
 0x10a   : > { %v619_v50 = vld [vmem:[%s618_s27] sm:$0x3]  ;;  %s627_s4 = scalar_lea.vmem [#allocation5], %s1868_s30  ;;  %s636_s0 = scalar_lea.vmem [#allocation6], %s1868_s30 }
 0x10b   : > { %v628_v55 = vld [vmem:[%s627_s4] sm:$0x3]  ;;  %s646_s9 = scalar_lea.vmem [#allocation2], %s1868_s30  ;;  %s369_s2 = sadd.s32 1, %s1612_s2  }
 0x10c   : > { %p366_p8 = scmp.ge.s32.totalorder %s369_s2, 8  }
 0x10d   : > { %v372_v27 = vld [vmem:[%s2075_s6] sm:$0xff]  ;;  %v373_v28 = vld [vmem:[%s2075_s6 + $0x8] sm:$0xff]  ;;  %v374_v29 = vld [vmem:[%s2075_s6 + $0x10] sm:$0xff] }
 0x10e   : > { %v1475_v31 = vpack.c.bf16 %v373_v28, %v372_v27  ;;  %v375_v32 = vld [vmem:[%s2075_s6 + $0x18] sm:$0xff]  ;;  %v456_v34 = vld [vmem:[%s2076_s3] sm:$0xff]  ;;  %v457_v35 = vld [vmem:[%s2076_s3 + $0x8] sm:$0xff] }
 0x10f   : > { %v458_v36 = vld [vmem:[%s2076_s3 + $0x10] sm:$0xff]  ;;  %v459_v37 = vld [vmem:[%s2076_s3 + $0x18] sm:$0xff]  ;;  %v1478_v38 = vpack.c.bf16 %v375_v32, %v374_v29  ;;  %v1481_v39 = vpack.c.bf16 %v457_v35, %v456_v34  ;;  %v537_v40 = vld [vmem:[%s2077_s28] sm:$0xff] }
 0x110   : > { %1476 = vmatpush3.bf16.msra.mxu0 %v1475_v31  ;;  %v538_v41 = vld [vmem:[%s2077_s28 + $0x8] sm:$0xff]  ;;  %v1484_v42 = vpack.c.bf16 %v459_v37, %v458_v36  ;;  %v539_v45 = vld [vmem:[%s2077_s28 + $0x10] sm:$0xff]  ;;  %v540_v46 = vld [vmem:[%s2077_s28 + $0x18] sm:$0xff] }
 0x111   : > { %1477 = vmatprep.subr.bf16.mxu0 %v1620_v30  ;;  %1482 = vmatpush3.bf16.msra.mxu1 %v1481_v39  ;;  %v1487_v44 = vpack.c.bf16 %v538_v41, %v537_v40  ;;  %v1490_v47 = vpack.c.bf16 %v540_v46, %v539_v45  ;;  %v1255_v48 = vld [vmem:[%s2078_s1] ss:$0 sm:$0xff]  ;;  %v653_v19 = vld [vmem:[%s2036_s13 + $0x8] sm:$0xff] (%p366_p8)  ;;  %v654_v21 = vld [vmem:[%s2036_s13 + $0x10] sm:$0xff] (%p366_p8) }
 0x112   : > { %1483 = vmatprep.subr.bf16.mxu1 %v1620_v30  ;;  %v637_v8 = vld [vmem:[%s636_s0] sm:$0x3]  ;;  %v655_v22 = vld [vmem:[%s2036_s13 + $0x18] sm:$0xff] (%p366_p8)  ;;  %v835_v28 = vld [vmem:[%s2038_s15 + $0x8] sm:$0xff] (%p366_p8) }
 0x113   :  { %v652_v18 = vld [vmem:[%s2036_s13] sm:$0xff] (%p366_p8)  ;;  %v1496_v24 = vpack.c.bf16 (%p366_p8), %v655_v22, %v654_v21  ;;  %v748_v29 = vld [vmem:[%s2037_s14 + $0x10] sm:$0xff] (%p366_p8)  ;;  %v837_v34 = vld [vmem:[%s2038_s15 + $0x18] sm:$0xff] (%p366_p8) }
 0x114   : > { %1479 = vmatpush3.bf16.msra.mxu0 %v1478_v38  ;;  %v1492_v20 = vpack.c.bf16 (%p366_p8), %v653_v19, %v652_v18  ;;  %v746_v25 = vld [vmem:[%s2037_s14] sm:$0xff] (%p366_p8) }
 0x115   : > { %1486 = vmatprep.subr.bf16.mxu0 %v1620_v30  ;;  %1485 = vmatpush3.bf16.msra.mxu1 %v1484_v42  ;;  %v834_v27 = vld [vmem:[%s2038_s15] sm:$0xff] (%p366_p8) }
 0x116   :  { %v1508_v31 = vpack.c.bf16 (%p366_p8), %v835_v28, %v834_v27  ;;  %v1263_v37 = vld [vmem:[%s2042_s19] ss:$0 sm:$0xff] (%p366_p8) }
 0x117   : > { %1372 = vmatmul.mubr.msk.f32.vlgmr.msra.gmra.mrb[0].mxu0 %vm187_vm2, %v371_v43  ;;  %v1266_v39 = vld [vmem:[%s2043_s20] ss:$0 sm:$0xff] (%p366_p8)  ;;  %s1951_s20 = smov (%p366_p8), 0  }
 0x118   : > { %1488 = vmatpush3.bf16.msra.mxu0 %v1487_v44  ;;  %1393 = vmatprep.mubr.msk.f32.mxu0 %vm1621_vm3, %v1622_v33  ;;  %v836_v33 = vld [vmem:[%s2038_s15 + $0x10] sm:$0xff] (%p366_p8) }
 0x119   : > { %1383 = vmatmul.mubr.msk.f32.vlgmr.msra.gmra.mrb[0].mxu1 %vm187_vm2, %v371_v43  ;;  %1489 = vmatprep.subr.bf16.mxu0 %v1620_v30  ;;  %v749_v30 = vld [vmem:[%s2037_s14 + $0x18] sm:$0xff] (%p366_p8)  ;;  %v1512_v36 = vpack.c.bf16 (%p366_p8), %v837_v34, %v836_v33 }
 0x11a   :  { %v1504_v32 = vpack.c.bf16 (%p366_p8), %v749_v30, %v748_v29 }
 0x11c   : > { %1491 = vmatpush3.bf16.msra.mxu0 %v1490_v47  ;;  %v1269_v47 = vld [vmem:[%s2044_s21] ss:$0 sm:$0xff] (%p366_p8) }
 0x11d   :  { %1493 = vmatprep.subr.bf16.mxu0 (%p366_p8), %v1492_v20 }
 0x11f   : > { %1394 = vmatmul.mubr.msk.f32.vlgmr.msra.gmra.mrb[2].mxu0 %vm187_vm2, %v371_v43 }
 0x120   :  { %1495 = vmatpush3.bf16.msra.mxu0 (%p366_p8), %v1492_v20 }
 0x121   :  { %1497 = vmatprep.subr.bf16.mxu0 (%p366_p8), %v1496_v24 }
 0x124   :  { %1499 = vmatpush3.bf16.msra.mxu0 (%p366_p8), %v1496_v24 }
 0x125   :  { %1509 = vmatprep.subr.bf16.mxu0 (%p366_p8), %v1508_v31 }
 0x1ea   : > { %v452_v49 = vpop.f32.mrb[0].mxu0 }
 0x1eb   : > { %v453_v52 = vadd.f32 %v1255_v48, %v452_v49  ;;  %v1373_v53 = vpop.f32.mrb[1].mxu0 }
 0x1ec   : > { %v533_v54 = vpop.f32.mrb[0].mxu1 }
 0x1ed   : > { %v620_v56 = vadd.f32 %v619_v50, %v453_v52  ;;  %v534_v57 = vadd.f32 %v1257_v51, %v533_v54  ;;  %v1384_v58 = vpop.f32.mrb[1].mxu1 }
 0x1ef   : > { %v1261_v59 = vmul.f32 -1.442695, %v620_v56  ;;  %v629_v60 = vadd.f32 %v628_v55, %v534_v57 }
 0x1f1   : > { %1558 = vpow2.f32 %v1261_v59  ;;  %v1262_v61 = vmul.f32 -1.442695, %v629_v60 }
 0x1f2   : > { %v614_v62 = vpop.f32.mrb[2].mxu0 }
 0x1f3   : > { %v1395_v63 = vpop.f32.mrb[3].mxu0  ;;  %1560 = vpow2.f32 %v1262_v61  ;;  %v615_v6 = vadd.f32 %v1259_v4, %v614_v62 }
 0x1fb   : > { %v1559_v1 = vpop.eup %1558 }
 0x1fc   : > { %v624_v2 = vadd.f32 1.0, %v1559_v1 }
 0x1fd   : > { %v1561_v3 = vpop.eup %1560 }
 0x1fe   : > { %1562 = vrcp.f32 %v624_v2  ;;  %v633_v5 = vadd.f32 1.0, %v1561_v3 }
 0x200   : > { %1564 = vrcp.f32 %v633_v5 }
 0x208   : > { %v1563_v7 = vpop.eup %1562 }
 0x209   : > { %v638_v9 = vmul.f32 %v1563_v7, %v615_v6 }
 0x20a   : > { %v1565_v11 = vpop.eup %1564 }
 0x20b   : > { %v639_v10 = vadd.f32 %v638_v9, %v637_v8  ;;  %v641_v12 = vsub.f32 1.0, %v1565_v11  ;;  %v643_v14 = vmul.f32 %v1565_v11, %v371_v43 }
 0x20d   : > { %1566 = vtanh.f32 %v639_v10 }
 0x216   :  { %368 = sbr.rel (!%p366_p8) target bundleno = 263 (0x107), region = 155 }
 0x217   : > { %v1567_v13 = vpop.eup %1566 }
 0x218   : > { %v642_v15 = vmul.f32 %v1567_v13, %v641_v12 }
 0x21a   : > { %v644_v16 = vadd.f32 %v643_v14, %v642_v15 }
 0x21c   : > { %645 = vst.msk [vmem:[#allocation3] sm:$0x3] %vm362_vm0, %v644_v16  ;;  %647 = vst.msk [vmem:[%s646_s9] sm:$0x3] %vm362_vm0, %v644_v16 }
 0x223   :  { %v648_v17 = vld [vmem:[#allocation3] sm:$0x3]  ;;  %v650_v23 = vld [vmem:[#allocation2] sm:$0xff]  ;;  %v651_v35 = vld [vmem:[#allocation2 + $0x8] sm:$0xff] }
 0x224   :  { %649 = vst.msk [vmem:[%s2049_s26] sm:$0x3] %vm362_vm0, %v648_v17  ;;  %922 = vst.msk [vmem:[#allocation3] sm:$0x3] %vm362_vm0, %v1619_v0  ;;  %1404 = vmatprep.mubr.msk.f32.mxu0 %vm187_vm2, %v650_v23  ;;  %v747_v0 = vld [vmem:[%s2037_s14 + $0x8] sm:$0xff]  ;;  %1415 = vmatprep.mubr.msk.f32.mxu1 %vm187_vm2, %v650_v23 }
 0x225   :  { %v1500_v26 = vpack.c.bf16 %v747_v0, %v746_v25  ;;  %1405 = vmatmul.mubr.msk.f32.vlgmr.msra.gmra.mrb[0].mxu0 %vm187_vm2, %v651_v35 }
 0x226   :  { %1511 = vmatpush3.bf16.msra.mxu0 %v1508_v31  ;;  %1426 = vmatprep.mubr.msk.f32.mxu0 %vm187_vm2, %v650_v23 }
 0x227   :  { %1501 = vmatprep.subr.bf16.mxu1 %v1500_v26  ;;  %1513 = vmatprep.subr.bf16.mxu0 %v1512_v36 }
 0x228   :  { %1503 = vmatpush3.bf16.msra.mxu1 %v1500_v26 }
 0x229   :  { %1505 = vmatprep.subr.bf16.mxu1 %v1504_v32 }
 0x22a   :  { %1515 = vmatpush3.bf16.msra.mxu0 %v1512_v36 }
 0x22c   :  { %1507 = vmatpush3.bf16.msra.mxu1 %v1504_v32 }
 0x22d   :  { %1427 = vmatmul.mubr.msk.f32.vlgmr.msra.gmra.mrb[2].mxu0 %vm187_vm2, %v651_v35 }
 0x22f   :  { %1416 = vmatmul.mubr.msk.f32.vlgmr.msra.gmra.mrb[0].mxu1 %vm187_vm2, %v651_v35 }
 0x2f8   :  { %v1406_v38 = vpop.f32.mrb[0].mxu0 }
 0x2f9   :  { %v741_v40 = vadd.f32 %v1406_v38, %v1263_v37  ;;  %v735_v41 = vpop.f32.mrb[1].mxu0 }
 0x2fa   :  { %v736_v42 = vadd.f32 %v1263_v37, %v735_v41 }
 0x2fb   :  { %745 = vst.msk [vmem:[#allocation4 + $0x8] sm:$0xff] %vm187_vm2, %v741_v40 }
 0x2fc   :  { %744 = vst.msk [vmem:[#allocation4] sm:$0xff] %vm187_vm2, %v736_v42 }
 0x300   :  { %v1428_v48 = vpop.f32.mrb[2].mxu0 }
 0x301   :  { %v917_v49 = vadd.f32 %v1428_v48, %v1269_v47  ;;  %v911_v50 = vpop.f32.mrb[3].mxu0 }
 0x302   :  { %v1417_v43 = vpop.f32.mrb[0].mxu1  ;;  %v912_v51 = vadd.f32 %v1269_v47, %v911_v50 }
 0x303   :  { %v829_v44 = vadd.f32 %v1417_v43, %v1266_v39  ;;  %v823_v45 = vpop.f32.mrb[1].mxu1  ;;  %921 = vst.msk [vmem:[#allocation6 + $0x8] sm:$0xff] %vm187_vm2, %v917_v49 }
 0x304   :  { %v824_v46 = vadd.f32 %v1266_v39, %v823_v45  ;;  %920 = vst.msk [vmem:[#allocation6] sm:$0xff] %vm187_vm2, %v912_v51 }
 0x305   :  { %833 = vst.msk [vmem:[#allocation5 + $0x8] sm:$0xff] %vm187_vm2, %v829_v44 }
 0x306   :  { %832 = vst.msk [vmem:[#allocation5] sm:$0xff] %vm187_vm2, %v824_v46 }
 0x307 LB: > { %v931_v52 = vld [vmem:[%s2039_s16] sm:$0xff]  ;;  %v932_v53 = vld [vmem:[%s2039_s16 + $0x8] sm:$0xff]  ;;  %v933_v54 = vld [vmem:[%s2039_s16 + $0x10] sm:$0xff]  ;;  %v1623_v55 = vmov 0.0|0.0   ;;  %vm1624_vm4 = vmmov 0   ;;  %v1625_v58 = vmov 0.0   ;;  %s1616_s20 = sphi %s1951_s20, %s928_s20  }
 0x308   : > { %1516 = vmatprep.subr.bf16.mxu0 %v1623_v55  ;;  %v1517_v56 = vpack.c.bf16 %v932_v53, %v931_v52  ;;  %v934_v57 = vld [vmem:[%s2039_s16 + $0x18] sm:$0xff]  ;;  %1437 = vmatprep.mubr.msk.f32.mxu0 %vm1624_vm4, %v1625_v58  ;;  %v1015_v59 = vld [vmem:[%s2040_s17] sm:$0xff]  ;;  %v1016_v60 = vld [vmem:[%s2040_s17 + $0x8] sm:$0xff]  ;;  %s1999_s3 = sshll.u32 %s1616_s20, 1  ;;  %s928_s20 = sadd.s32 1, %s1616_s20  }
 0x309   : > { %1522 = vmatprep.subr.bf16.mxu1 %v1623_v55  ;;  %v1017_v61 = vld [vmem:[%s2040_s17 + $0x10] sm:$0xff]  ;;  %v1018_v62 = vld [vmem:[%s2040_s17 + $0x18] sm:$0xff]  ;;  %1448 = vmatprep.mubr.msk.f32.mxu1 %vm1624_vm4, %v1625_v58  ;;  %v1520_v63 = vpack.c.bf16 %v934_v57, %v933_v54  ;;  %v1523_v1 = vpack.c.bf16 %v1016_v60, %v1015_v59  ;;  %v1096_v2 = vld [vmem:[%s2041_s18] sm:$0xff]  ;;  %s1177_s4 = scalar_lea.vmem [#allocation4], %s1999_s3  ;;  %s1186_s13 = scalar_lea.vmem [#allocation5], %s1999_s3 }
 0x30a   : > { %1518 = vmatpush3.bf16.msra.mxu0 %v1517_v56  ;;  %v1097_v3 = vld [vmem:[%s2041_s18 + $0x8] sm:$0xff]  ;;  %v1526_v4 = vpack.c.bf16 %v1018_v62, %v1017_v61  ;;  %v930_v5 = vld [vmem:[#allocation3] sm:$0x3]  ;;  %v1099_v8 = vld [vmem:[%s2041_s18 + $0x18] sm:$0xff]  ;;  %s1195_s0 = scalar_lea.vmem [#allocation6], %s1999_s3  ;;  %s1205_s10 = scalar_lea.vmem %s2048_s25, %s1999_s3 }
 0x30b   : > { %1519 = vmatprep.subr.bf16.mxu0 %v1623_v55  ;;  %1524 = vmatpush3.bf16.msra.mxu1 %v1523_v1  ;;  %v1529_v6 = vpack.c.bf16 %v1097_v3, %v1096_v2  ;;  %v1098_v7 = vld [vmem:[%s2041_s18 + $0x10] sm:$0xff]  ;;  %v1273_v10 = vld [vmem:[%s2045_s22] ss:$0 sm:$0xff]  ;;  %v1277_v28 = vld [vmem:[#allocation7] ss:$0 sm:$0xff]  ;;  %p925_p9 = scmp.ge.s32.totalorder %s928_s20, 8  }
 0x30c   : > { %1525 = vmatprep.subr.bf16.mxu1 %v1623_v55  ;;  %v1532_v9 = vpack.c.bf16 %v1099_v8, %v1098_v7  ;;  %v1178_v12 = vld [vmem:[%s1177_s4] sm:$0x3] }
 0x30d   : > { %v1275_v13 = vld [vmem:[%s2046_s23] ss:$0 sm:$0xff] }
 0x30e   : > { %1521 = vmatpush3.bf16.msra.mxu0 %v1520_v63  ;;  %v1187_v17 = vld [vmem:[%s1186_s13] sm:$0x3] }
 0x30f   : > { %1528 = vmatprep.subr.bf16.mxu0 %v1623_v55  ;;  %1527 = vmatpush3.bf16.msra.mxu1 %v1526_v4  ;;  %v1196_v32 = vld [vmem:[%s1195_s0] sm:$0x3] }
 0x311   : > { %1438 = vmatmul.mubr.msk.f32.vlgmr.msra.gmra.mrb[0].mxu0 %vm187_vm2, %v930_v5 }
 0x312   : > { %1530 = vmatpush3.bf16.msra.mxu0 %v1529_v6  ;;  %1459 = vmatprep.mubr.msk.f32.mxu0 %vm1624_vm4, %v1625_v58 }
 0x313   : > { %1449 = vmatmul.mubr.msk.f32.vlgmr.msra.gmra.mrb[0].mxu1 %vm187_vm2, %v930_v5  ;;  %1531 = vmatprep.subr.bf16.mxu0 %v1623_v55 }
 0x316   : > { %1533 = vmatpush3.bf16.msra.mxu0 %v1532_v9 }
 0x319   : > { %1460 = vmatmul.mubr.msk.f32.vlgmr.msra.gmra.mrb[2].mxu0 %vm187_vm2, %v930_v5 }
 0x3e4   : > { %v1011_v11 = vpop.f32.mrb[0].mxu0 }
 0x3e5   : > { %v1012_v14 = vadd.f32 %v1273_v10, %v1011_v11  ;;  %v1439_v15 = vpop.f32.mrb[1].mxu0 }
 0x3e6   : > { %v1092_v16 = vpop.f32.mrb[0].mxu1 }
 0x3e7   : > { %v1179_v18 = vadd.f32 %v1178_v12, %v1012_v14  ;;  %v1093_v19 = vadd.f32 %v1275_v13, %v1092_v16  ;;  %v1450_v20 = vpop.f32.mrb[1].mxu1 }
 0x3e9   : > { %v1279_v21 = vmul.f32 -1.442695, %v1179_v18  ;;  %v1188_v22 = vadd.f32 %v1187_v17, %v1093_v19 }
 0x3eb   : > { %1568 = vpow2.f32 %v1279_v21  ;;  %v1280_v23 = vmul.f32 -1.442695, %v1188_v22 }
 0x3ec   : > { %v1173_v24 = vpop.f32.mrb[2].mxu0 }
 0x3ed   : > { %v1461_v25 = vpop.f32.mrb[3].mxu0  ;;  %1570 = vpow2.f32 %v1280_v23  ;;  %v1174_v30 = vadd.f32 %v1277_v28, %v1173_v24 }
 0x3f5   : > { %v1569_v0 = vpop.eup %1568 }
 0x3f6   : > { %v1183_v26 = vadd.f32 1.0, %v1569_v0 }
 0x3f7   : > { %v1571_v27 = vpop.eup %1570 }
 0x3f8   : > { %1572 = vrcp.f32 %v1183_v26  ;;  %v1192_v29 = vadd.f32 1.0, %v1571_v27 }
 0x3fa   : > { %1574 = vrcp.f32 %v1192_v29 }
 0x402   : > { %v1573_v31 = vpop.eup %1572 }
 0x403   : > { %v1197_v33 = vmul.f32 %v1573_v31, %v1174_v30 }
 0x404   : > { %v1575_v35 = vpop.eup %1574 }
 0x405   : > { %v1198_v34 = vadd.f32 %v1197_v33, %v1196_v32  ;;  %v1200_v36 = vsub.f32 1.0, %v1575_v35  ;;  %v1202_v38 = vmul.f32 %v1575_v35, %v930_v5 }
 0x407   : > { %1576 = vtanh.f32 %v1198_v34 }
 0x410   :  { %927 = sbr.rel (!%p925_p9) target bundleno = 775 (0x307), region = 166 }
 0x411   : > { %v1577_v37 = vpop.eup %1576 }
 0x412   : > { %v1201_v39 = vmul.f32 %v1577_v37, %v1200_v36 }
 0x414   : > { %v1203_v40 = vadd.f32 %v1202_v38, %v1201_v39 }
 0x416   : > { %1204 = vst.msk [vmem:[#allocation3] sm:$0x3] %vm362_vm0, %v1203_v40  ;;  %1206 = vst.msk [vmem:[%s1205_s10] sm:$0x3] %vm362_vm0, %v1203_v40 }
 0x41d   :  { %v1207_v41 = vld [vmem:[#allocation3] sm:$0x3] }
 0x41e   :  { %1281 = vst.msk [vmem:[%s2049_s26 + $0x2] sm:$0x3] %vm362_vm0, %v1207_v41 }
 0x41f   :  { %1218 = vsyncpa [#allocation8], 1 }

// kernel: seq2seq_forward.4
= control target key start
LH: loop header
LB: loop body
LE: loop exit
PB: predicated region body
PF: predicated region fallthrough
CT: control target
= control target key end

     0   :  { %s2532_s6 = smov 1   ;;  %s2533_s10 = smov 2   ;;  %s2952_s0 = inlined_call_operand.smem [shape: u32[32], index: -1, kind: input, shape index: {}] }
   0x1   :  { %s2583_s5 = sld [smem:[%s2952_s0]]   ;;  %s2534_s14 = smov 3  }
   0x2   :  { %s2588_s9 = sld [smem:[%s2952_s0 + %s2532_s6]]   ;;  %s2535_s18 = smov 4  }
   0x3   :  { %s2593_s13 = sld [smem:[%s2952_s0 + %s2533_s10]]   ;;  %s2536_s22 = smov 5  }
   0x4   :  { %s2598_s17 = sld [smem:[%s2952_s0 + %s2534_s14]]   ;;  %s2537_s26 = smov 6  }
   0x5   :  { %s2603_s21 = sld [smem:[%s2952_s0 + %s2535_s18]]   ;;  %s2538_s30 = smov 7  }
   0x6   :  { %s2608_s25 = sld [smem:[%s2952_s0 + %s2536_s22]]   ;;  %s2539_s4 = smov 8  }
   0x7   :  { %s2613_s29 = sld [smem:[%s2952_s0 + %s2537_s26]]   ;;  %s2540_s10 = smov 9  }
   0x8   :  { %s2618_s3 = sld [smem:[%s2952_s0 + %s2538_s30]]   ;;  %s2541_s15 = smov 10  }
   0x9   :  { %s2623_s8 = sld [smem:[%s2952_s0 + %s2539_s4]]   ;;  %s2542_s20 = smov 11  }
   0xa   :  { %s2628_s14 = sld [smem:[%s2952_s0 + %s2540_s10]]   ;;  %s2543_s26 = smov 12  }
   0xb   :  { %s2633_s19 = sld [smem:[%s2952_s0 + %s2541_s15]]   ;;  %s2544_s1 = smov 13  }
   0xc   :  { %s2638_s24 = sld [smem:[%s2952_s0 + %s2542_s20]]   ;;  %s2545_s7 = smov 14  }
   0xd   :  { %s2643_s30 = sld [smem:[%s2952_s0 + %s2543_s26]]   ;;  %s2546_s15 = smov 15  }
   0xe   :  { %s2648_s6 = sld [smem:[%s2952_s0 + %s2544_s1]]   ;;  %s2547_s22 = smov 16  }
   0xf   :  { %2963 = sst [smem:[#allocation20_spill]] %s2623_s8  ;;  %s2548_s28 = smov 17  }
  0x10   :  { %2964 = sst [smem:[#allocation21_spill]] %s2628_s14 }
  0x11   :  { %2965 = sst [smem:[#allocation22_spill]] %s2633_s19 }
  0x12   :  { %2966 = sst [smem:[#allocation23_spill]] %s2638_s24 }
  0x13   :  { %s2653_s12 = sld [smem:[%s2952_s0 + %s2545_s7]]   ;;  %s2549_s7 = smov 18  }
  0x14   :  { %s2658_s20 = sld [smem:[%s2952_s0 + %s2546_s15]]   ;;  %s2550_s15 = smov 19  }
  0x15   :  { %s2663_s27 = sld [smem:[%s2952_s0 + %s2547_s22]]   ;;  %s2551_s22 = smov 20  }
  0x16   :  { %s2668_s4 = sld [smem:[%s2952_s0 + %s2548_s28]]   ;;  %s2552_s28 = smov 21  }
  0x17   :  { %s2673_s24 = sld [smem:[%s2952_s0 + %s2549_s7]]   ;;  %s2553_s7 = smov 22  }
  0x1a   :  { %2967 = sst [smem:[#allocation24_spill]] %s2658_s20 }
  0x1b   :  { %2968 = sst [smem:[#allocation25_spill]] %s2663_s27 }
  0x1c   :  { %2969 = sst [smem:[#allocation26_spill]] %s2668_s4 }
  0x1d   :  { %2970 = sst [smem:[#allocation27_spill]] %s2673_s24 }
  0x1e   :  { %s2678_s20 = sld [smem:[%s2952_s0 + %s2550_s15]]   ;;  %s2554_s15 = smov 23  }
  0x1f   :  { %s2683_s27 = sld [smem:[%s2952_s0 + %s2551_s22]]   ;;  %s2555_s22 = smov 24  }
  0x20   :  { %s2688_s4 = sld [smem:[%s2952_s0 + %s2552_s28]]   ;;  %s2556_s28 = smov 25  }
  0x21   :  { %s2693_s24 = sld [smem:[%s2952_s0 + %s2553_s7]]   ;;  %s2557_s7 = smov 26  }
  0x24   :  { %2971 = sst [smem:[#allocation28_spill]] %s2678_s20 }
  0x25   :  { %2972 = sst [smem:[#allocation29_spill]] %s2683_s27 }
  0x26   :  { %2973 = sst [smem:[#allocation30_spill]] %s2688_s4 }
  0x27   :  { %2974 = sst [smem:[#allocation31_spill]] %s2693_s24 }
  0x28   :  { %s2698_s20 = sld [smem:[%s2952_s0 + %s2554_s15]]   ;;  %s2558_s15 = smov 27  }
  0x29   :  { %s2703_s27 = sld [smem:[%s2952_s0 + %s2555_s22]]   ;;  %s2559_s22 = smov 28  }
  0x2a   :  { %s2708_s4 = sld [smem:[%s2952_s0 + %s2556_s28]]   ;;  %s2560_s28 = smov 29  }
  0x2b   :  { %s2713_s24 = sld [smem:[%s2952_s0 + %s2557_s7]]   ;;  %s2561_s7 = smov 30  }
  0x2c   :  { %s2728_s14 = sld [smem:[%s2952_s0 + %s2560_s28]]  }
  0x2d   :  { %s2733_s19 = sld [smem:[%s2952_s0 + %s2561_s7]]  }
  0x2e   :  { %2975 = sst [smem:[#allocation32_spill]] %s2698_s20 }
  0x2f   :  { %2976 = sst [smem:[#allocation33_spill]] %s2703_s27 }
  0x30   :  { %s2718_s20 = sld [smem:[%s2952_s0 + %s2558_s15]]   ;;  %s2562_s15 = smov 31  }
  0x31   :  { %s2723_s27 = sld [smem:[%s2952_s0 + %s2559_s22]]  }
  0x32   :  { %s2738_s8 = sld [smem:[%s2952_s0 + %s2562_s15]]  }
  0x33   :  { %69 = vsyncpa [#allocation7], 0 }
  0x34   :  { %70 = vsyncpa [#allocation10], 0 }
  0x35   :  { %71 = vsyncpa [#allocation13], 0 }
  0x36   :  { %72 = vsyncpa [#allocation8], 0  ;;  %s2563_s22 = smov [#allocation9]   ;;  %s2564_s26 = smov [#allocation12]  }
  0x37   :  { %s139_s23 = sshll.u32 %s2563_s22, 4  ;;  %s159_s28 = sshll.u32 %s2564_s26, 4  ;;  %s140_s23 = int_to_ptr.vmem [resolvable:$true] %s139_s23  ;;  %s160_s28 = int_to_ptr.vmem [resolvable:$true] %s159_s28 }
  0x38   :  { %s2384_s1 = scalar_lea.hbm %s2713_s24, 16 }
  0x39   :  { %p2385_p0 = scmp.ne.s32.totalorder %s2713_s24, %s2384_s1  ;;  %p2388_p1 = scmp.lt.u32.totalorder %s2384_s1, %s2713_s24 }
  0x3b   :  { %p2390_p2 = pnand %p2388_p1, %p2385_p0 }
  0x3d   :  { %2393 = shalt.err (!%p2390_p2)
}
  0x3e   :  { %s2394_s0 = scalar_lea.vmem %s140_s23, 16  ;;  %s2398_s2 = scalar_lea.vmem %s140_s23, 32 }
  0x3f   :  { %p2395_p3 = scmp.ne.s32.totalorder %s140_s23, %s2394_s0  ;;  %p2399_p4 = scmp.lt.s32.totalorder %s140_s23, %s140_s23 }
  0x40   :  { %p2400_p5 = scmp.lt.s32.totalorder %s2398_s2, %s2394_s0 }
  0x42   :  { %p2401_p6 = por %p2400_p5, %p2399_p4 }
  0x44   :  { %p2402_p7 = pnand %p2401_p6, %p2395_p3 }
  0x46   :  { %2405 = shalt.err (!%p2402_p7)
}
  0x47   :  { %142 = dma.hbm_to_vmem [thread:$0]  %s2713_s24, 16, %s140_s23, [#allocation10]  }
  0x48   :  { %s2406_s7 = scalar_lea.hbm %s2723_s27, 16 }
  0x49   :  { %p2407_p8 = scmp.ne.s32.totalorder %s2723_s27, %s2406_s7  ;;  %p2410_p9 = scmp.lt.u32.totalorder %s2406_s7, %s2723_s27 }
  0x4b   :  { %p2412_p10 = pnand %p2410_p9, %p2407_p8 }
  0x4d   :  { %2415 = shalt.err (!%p2412_p10)
}
  0x4e   :  { %s2416_s10 = scalar_lea.vmem %s160_s28, 16  ;;  %s2420_s11 = scalar_lea.vmem %s160_s28, 32 }
  0x4f   :  { %p2417_p11 = scmp.ne.s32.totalorder %s160_s28, %s2416_s10  ;;  %p2421_p12 = scmp.lt.s32.totalorder %s160_s28, %s160_s28 }
  0x50   :  { %p2422_p13 = scmp.lt.s32.totalorder %s2420_s11, %s2416_s10 }
  0x52   :  { %p2423_p0 = por %p2422_p13, %p2421_p12 }
  0x54   :  { %p2424_p1 = pnand %p2423_p0, %p2417_p11 }
  0x56   :  { %2427 = shalt.err (!%p2424_p1)
}
  0x57   :  { %162 = dma.hbm_to_vmem [thread:$0]  %s2723_s27, 16, %s160_s28, [#allocation13]  }
  0x58   :  { %s2565_s15 = smov [#allocation6]   ;;  %s2566_s16 = smov [#allocation11]  }
  0x59   :  { %s129_s24 = sshll.u32 %s2565_s15, 4  ;;  %s149_s18 = sshll.u32 %s2566_s16, 4  ;;  %s130_s24 = int_to_ptr.vmem [resolvable:$true] %s129_s24  ;;  %s150_s18 = int_to_ptr.vmem [resolvable:$true] %s149_s18 }
  0x5a   :  { %s2428_s22 = scalar_lea.hbm %s2708_s4, 16 }
  0x5b   :  { %p2429_p2 = scmp.ne.s32.totalorder %s2708_s4, %s2428_s22  ;;  %p2432_p3 = scmp.lt.u32.totalorder %s2428_s22, %s2708_s4 }
  0x5d   :  { %p2434_p4 = pnand %p2432_p3, %p2429_p2 }
  0x5f   :  { %2437 = shalt.err (!%p2434_p4)
}
  0x60   :  { %s2438_s23 = scalar_lea.vmem %s130_s24, 16  ;;  %s2442_s26 = scalar_lea.vmem %s130_s24, 32 }
  0x61   :  { %p2439_p5 = scmp.ne.s32.totalorder %s130_s24, %s2438_s23  ;;  %p2443_p6 = scmp.lt.s32.totalorder %s130_s24, %s130_s24 }
  0x62   :  { %p2444_p7 = scmp.lt.s32.totalorder %s2442_s26, %s2438_s23 }
  0x64   :  { %p2445_p8 = por %p2444_p7, %p2443_p6 }
  0x66   :  { %p2446_p9 = pnand %p2445_p8, %p2439_p5 }
  0x68   :  { %2449 = shalt.err (!%p2446_p9)
}
  0x69   :  { %132 = dma.hbm_to_vmem [thread:$0]  %s2708_s4, 16, %s130_s24, [#allocation7]  }
  0x6a   :  { %s2450_s27 = scalar_lea.hbm %s2718_s20, 16 }
  0x6b   :  { %p2451_p10 = scmp.ne.s32.totalorder %s2718_s20, %s2450_s27  ;;  %p2454_p11 = scmp.lt.u32.totalorder %s2450_s27, %s2718_s20 }
  0x6d   :  { %p2456_p12 = pnand %p2454_p11, %p2451_p10 }
  0x6f   :  { %2459 = shalt.err (!%p2456_p12)
}
  0x70   :  { %s2460_s28 = scalar_lea.vmem %s150_s18, 16  ;;  %s2464_s1 = scalar_lea.vmem %s150_s18, 32 }
  0x71   :  { %p2461_p13 = scmp.ne.s32.totalorder %s150_s18, %s2460_s28  ;;  %p2465_p0 = scmp.lt.s32.totalorder %s150_s18, %s150_s18 }
  0x72   :  { %p2466_p1 = scmp.lt.s32.totalorder %s2464_s1, %s2460_s28 }
  0x74   :  { %p2467_p2 = por %p2466_p1, %p2465_p0 }
  0x76   :  { %p2468_p3 = pnand %p2467_p2, %p2461_p13 }
  0x78   :  { %2471 = shalt.err (!%p2468_p3)
}
  0x79   :  { %152 = dma.hbm_to_vmem [thread:$0]  %s2718_s20, 16, %s150_s18, [#allocation10]  }
  0x7a   :  { %s2567_s0 = smov [#allocation14]   ;;  %s2472_s2 = scalar_lea.hbm %s2728_s14, 16 }
  0x7b   :  { %s169_s4 = sshll.u32 %s2567_s0, 4  ;;  %p2473_p4 = scmp.ne.s32.totalorder %s2728_s14, %s2472_s2  ;;  %s170_s4 = int_to_ptr.vmem [resolvable:$true] %s169_s4 }
  0x7c   :  { %p2476_p5 = scmp.lt.u32.totalorder %s2472_s2, %s2728_s14 }
  0x7e   :  { %p2478_p6 = pnand %p2476_p5, %p2473_p4 }
  0x80   :  { %2481 = shalt.err (!%p2478_p6)
}
  0x81   :  { %s2482_s7 = scalar_lea.vmem %s170_s4, 16  ;;  %s2486_s10 = scalar_lea.vmem %s170_s4, 32 }
  0x82   :  { %p2483_p7 = scmp.ne.s32.totalorder %s170_s4, %s2482_s7  ;;  %p2487_p8 = scmp.lt.s32.totalorder %s170_s4, %s170_s4 }
  0x83   :  { %p2488_p9 = scmp.lt.s32.totalorder %s2486_s10, %s2482_s7 }
  0x85   :  { %p2489_p10 = por %p2488_p9, %p2487_p8 }
  0x87   :  { %p2490_p11 = pnand %p2489_p10, %p2483_p7 }
  0x89   :  { %2493 = shalt.err (!%p2490_p11)
}
  0x8a   :  { %172 = dma.hbm_to_vmem [thread:$0]  %s2728_s14, 16, %s170_s4, [#allocation13]  }
  0x8b   :  { %2520 = dma.done.wait [#allocation7], 16  }
  0x8c   :  { %2521 = vsyncadd [#allocation7], 4294967280 }
  0x8d   :  { %2522 = dma.done.wait [#allocation10], 32  }
  0x8e   :  { %2523 = vsyncadd [#allocation10], 4294967264 }
  0x8f   :  { %2524 = dma.done.wait [#allocation13], 32  }
  0x90   :  { %2525 = vsyncadd [#allocation13], 4294967264  ;;  %vm190_vm0 = vcmask 254976   ;;  %vm204_vm1 = vcmask 130048   ;;  %v188_v0 = vld [vmem:[%s2593_s13] sm:$0x3] }
  0x91   :  { %v189_v1 = vld [vmem:[%s2593_s13 + $0x2] sm:$0x3]  ;;  %191 = vst.msk [vmem:[#allocation2] sm:$0x3] %vm190_vm0, %v188_v0  ;;  %v196_v3 = vld [vmem:[%s2598_s17 + $0x8] sm:$0xff]  ;;  %vm286_vm2 = vcmask 261120  }
  0x92   :  { %v195_v2 = vld [vmem:[%s2598_s17] sm:$0xff]  ;;  %192 = vst.msk [vmem:[#allocation2 + $0x2] sm:$0x3] %vm190_vm0, %v189_v1  ;;  %v290_v7 = vld [vmem:[%s2603_s21 + $0x8] sm:$0xff] }
  0x93   :  { %v193_v4 = vld [vmem:[%s2583_s5] sm:$0xff]  ;;  %v2205_v5 = vpack.c.bf16 %v196_v3, %v195_v2  ;;  %v376_v10 = vld [vmem:[%s2608_s25 + $0x8] sm:$0xff] }
  0x94   :  { %2036 = vmatprep.mubr.msk.f32.mxu0 %vm204_vm1, %v193_v4  ;;  %v289_v6 = vld [vmem:[%s2603_s21] sm:$0xff]  ;;  %2043 = vmatprep.mubr.msk.f32.mxu1 %vm204_vm1, %v193_v4  ;;  %v194_v12 = vld [vmem:[%s2583_s5 + $0x8] sm:$0xff]  ;;  %s2787_s5 = smov 0  }
  0x95   :  { %v375_v8 = vld [vmem:[%s2608_s25] sm:$0xff]  ;;  %v2209_v9 = vpack.c.bf16 %v290_v7, %v289_v6  ;;  %2206 = vmatprep.subr.bf16.mxu0 %v2205_v5 }
  0x96   :  { %v2213_v11 = vpack.c.bf16 %v376_v10, %v375_v8  ;;  %2208 = vmatpush3.bf16.msra.mxu0 %v2205_v5  ;;  %v1910_v13 = vld [vmem:[%s2643_s30] ss:$0 sm:$0xff] }
  0x97   :  { %2210 = vmatprep.subr.bf16.mxu1 %v2209_v9  ;;  %v1913_v15 = vld [vmem:[%s2648_s6] ss:$0 sm:$0xff] }
  0x98   :  { %2214 = vmatprep.subr.bf16.mxu0 %v2213_v11  ;;  %2212 = vmatpush3.bf16.msra.mxu1 %v2209_v9  ;;  %v1916_v20 = vld [vmem:[%s2653_s12] ss:$0 sm:$0xff] }
  0x99   :  { %2037 = vmatmul.mubr.msk.f32.vlgmr.msra.gmra.mrb[0].mxu0 %vm204_vm1, %v194_v12 }
  0x9a   :  { %2216 = vmatpush3.bf16.msra.mxu0 %v2213_v11  ;;  %2050 = vmatprep.mubr.msk.f32.mxu0 %vm204_vm1, %v193_v4 }
  0x9b   :  { %2044 = vmatmul.mubr.msk.f32.vlgmr.msra.gmra.mrb[0].mxu1 %vm204_vm1, %v194_v12 }
  0x9d   :  { %2051 = vmatmul.mubr.msk.f32.vlgmr.msra.gmra.mrb[2].mxu0 %vm204_vm1, %v194_v12 }
 0x16c   :  { %v2038_v14 = vpop.f32.mrb[0].mxu0 }
 0x16d   :  { %v283_v16 = vadd.f32 %v2038_v14, %v1910_v13  ;;  %v277_v17 = vpop.f32.mrb[1].mxu0 }
 0x16e   :  { %v278_v18 = vadd.f32 %v1910_v13, %v277_v17  ;;  %v2045_v19 = vpop.f32.mrb[0].mxu1 }
 0x16f   :  { %288 = vst.msk [vmem:[#allocation3 + $0x8] sm:$0xff] %vm286_vm2, %v283_v16  ;;  %v370_v21 = vadd.f32 %v2045_v19, %v1913_v15  ;;  %v364_v22 = vpop.f32.mrb[1].mxu1 }
 0x170   :  { %287 = vst.msk [vmem:[#allocation3] sm:$0xff] %vm286_vm2, %v278_v18  ;;  %v2052_v23 = vpop.f32.mrb[2].mxu0  ;;  %v365_v24 = vadd.f32 %v1913_v15, %v364_v22 }
 0x171   :  { %374 = vst.msk [vmem:[#allocation4 + $0x8] sm:$0xff] %vm286_vm2, %v370_v21  ;;  %v456_v25 = vadd.f32 %v2052_v23, %v1916_v20  ;;  %v450_v26 = vpop.f32.mrb[3].mxu0 }
 0x172   :  { %373 = vst.msk [vmem:[#allocation4] sm:$0xff] %vm286_vm2, %v365_v24  ;;  %v451_v27 = vadd.f32 %v1916_v20, %v450_v26 }
 0x173   :  { %460 = vst.msk [vmem:[#allocation5 + $0x8] sm:$0xff] %vm286_vm2, %v456_v25 }
 0x174   :  { %459 = vst.msk [vmem:[#allocation5] sm:$0xff] %vm286_vm2, %v451_v27 }
 0x175 LB: > { %v469_v28 = vld [vmem:[%s2588_s9 + $0x8] sm:$0xff]  ;;  %v468_v29 = vld [vmem:[%s2588_s9] sm:$0xff]  ;;  %v484_v30 = vlaneseq  ;;  %v2568_v31 = vmov 0.0   ;;  %v2569_v33 = vmov 1966171168   ;;  %vm2570_vm3 = vmmov 0   ;;  %s2530_s5 = sphi %s2787_s5, %s466_s5  }
 0x176   : > { %2058 = vmatprep.subr.mxu1 %v2568_v31  ;;  %2053 = vmatprep.subr.mxu0 %v2568_v31  ;;  %v1920_v32 = vld.sshfl [vmem:[#allocation2 + $0x2] sm:$0x11 pattern:$0x75316420]  ;;  %v482_v34 = vunpack.c.l.s4 %v2569_v33  ;;  %vm645_vm4 = vcmask 57344   ;;  %v2571_v57 = vmov 0.0|0.0  }
 0x177   : > { %2059 = vmatpush3.xpose.msk.msra.mxu1 %vm286_vm2, %v469_v28  ;;  %2060 = vmatprep.mubr.msk.f32.mxu1 %vm2570_vm3, %v2568_v31  ;;  %v485_v35 = vshrl.u32 %v484_v30, 7  ;;  %v480_v36 = vcombine.high %v1920_v32, %v1920_v32  ;;  %v902_v60 = vld [vmem:[%s2618_s3] sm:$0xff]  ;;  %v903_v61 = vld [vmem:[%s2618_s3 + $0x8] sm:$0xff]  ;;  %vm668_vm5 = vcmask 64512   ;;  %s2977_s13 = sld [smem:[#allocation20_spill]]  ;;  %s2978_s17 = sld [smem:[#allocation22_spill]] }
 0x178   : > { %2054 = vmatpush3.xpose.msk.msra.mxu0 %vm286_vm2, %v468_v29  ;;  %v483_v37 = vunpack.c.0.s8 %v482_v34  ;;  %2055 = vmatprep.mubr.msk.f32.mxu0 %vm2570_vm3, %v2568_v31  ;;  %v2224_v63 = vpack.c.bf16 %v903_v61, %v902_v60  ;;  %v818_v1 = vld [vmem:[%s2613_s29] sm:$0xff]  ;;  %v819_v2 = vld [vmem:[%s2613_s29 + $0x8] sm:$0xff]  ;;  %v820_v6 = vld [vmem:[%s2613_s29 + $0x10] sm:$0xff]  ;;  %vm825_vm6 = vcmask 1041409   ;;  %s2979_s21 = sld [smem:[#allocation21_spill]]  ;;  %s2980_s25 = sld [smem:[#allocation23_spill]] }
 0x179   : > { %2068 = vmatprep.subr.mxu1 %v2568_v31  ;;  %2063 = vmatprep.subr.mxu0 %v2568_v31  ;;  %v2218_v4 = vpack.c.bf16 %v819_v2, %v818_v1  ;;  %v821_v7 = vld [vmem:[%s2613_s29 + $0x18] sm:$0xff]  ;;  %v904_v9 = vld [vmem:[%s2618_s3 + $0x10] sm:$0xff]  ;;  %s2981_s14 = sld [smem:[#allocation27_spill]]  ;;  %s2982_s30 = sld [smem:[#allocation28_spill]] }
 0x17a   : > { %v486_v38 = vsub.s32 %v483_v37, %v485_v35  ;;  %v2221_v8 = vpack.c.bf16 %v821_v7, %v820_v6  ;;  %v905_v10 = vld [vmem:[%s2618_s3 + $0x18] sm:$0xff]  ;;  %s2983_s6 = sld [smem:[#allocation24_spill]]  ;;  %s2984_s12 = sld [smem:[#allocation25_spill]] }
 0x17b   : > { %v2227_v11 = vpack.c.bf16 %v905_v10, %v904_v9  ;;  %s2892_s20 = sshll.u32 %s2530_s5, 1  ;;  %s2985_s24 = sld [smem:[#allocation26_spill]] }
 0x17c   : > { %v494_v39 = vrot.slane %v480_v36, %v486_v38  ;;  %v487_v40 = vrot.slane %v1920_v32, %v486_v38  ;;  %v2852_v36 = vld [vmem:[#allocation2] sm:$0x3]  ;;  %s816_s11 = scalar_lea.vmem [#allocation3], %s2892_s20  ;;  %s900_s15 = scalar_lea.vmem [#allocation4], %s2892_s20 }
 0x17d   : > { %v979_v12 = vld [vmem:[%s2977_s13] sm:$0xff]  ;;  %v980_v14 = vld [vmem:[%s2977_s13 + $0x8] sm:$0xff]  ;;  %v981_v21 = vld [vmem:[%s2977_s13 + $0x10] sm:$0xff]  ;;  %s2986_s16 = sld [smem:[#allocation29_spill]]  ;;  %s2987_s18 = sld [smem:[#allocation31_spill]] }
 0x17e   : > { %2061 = vmatmul.mubr.msk.f32.vlgmr.msra.gmra.mrb[0].mxu1 %vm286_vm2, %v494_v39  ;;  %2056 = vmatmul.mubr.msk.f32.vlgmr.msra.gmra.mrb[0].mxu0 %vm286_vm2, %v487_v40  ;;  %v1138_v15 = vld [vmem:[%s2978_s17] sm:$0xff]  ;;  %v1139_v16 = vld [vmem:[%s2978_s17 + $0x8] sm:$0xff]  ;;  %v2230_v19 = vpack.c.bf16 %v980_v14, %v979_v12  ;;  %v982_v23 = vld [vmem:[%s2977_s13 + $0x18] sm:$0xff]  ;;  %s977_s22 = scalar_lea.vmem [#allocation5], %s2892_s20  ;;  %s2988_s23 = sld [smem:[#allocation30_spill]] }
 0x17f   : > { %2069 = vmatpush3.msra.mxu1 %v469_v28  ;;  %2070 = vmatprep.mubr.msk.f32.mxu1 %vm2570_vm3, %v2568_v31  ;;  %v2242_v20 = vpack.c.bf16 %v1139_v16, %v1138_v15  ;;  %v1140_v24 = vld [vmem:[%s2978_s17 + $0x10] sm:$0xff]  ;;  %v1141_v25 = vld [vmem:[%s2978_s17 + $0x18] sm:$0xff]  ;;  %v2233_v28 = vpack.c.bf16 %v982_v23, %v981_v21  ;;  %v1054_v30 = vld [vmem:[%s2979_s21] sm:$0xff]  ;;  %s2989_s26 = sld [smem:[#allocation32_spill]]  ;;  %s2990_s27 = sld [smem:[#allocation33_spill]] }
 0x180   : > { %2064 = vmatpush3.msra.mxu0 %v468_v29  ;;  %2065 = vmatprep.mubr.msk.f32.mxu0 %vm2570_vm3, %v2568_v31  ;;  %v2245_v29 = vpack.c.bf16 %v1141_v25, %v1140_v24  ;;  %v1055_v32 = vld [vmem:[%s2979_s21 + $0x8] sm:$0xff]  ;;  %v1219_v33 = vld [vmem:[%s2980_s25] sm:$0xff]  ;;  %v1056_v37 = vld [vmem:[%s2979_s21 + $0x10] sm:$0xff]  ;;  %s1837_s28 = scalar_lea.vmem %s2733_s19, %s2892_s20  ;;  %s466_s5 = sadd.s32 1, %s2530_s5  }
 0x181   : > { %2217 = vmatprep.subr.bf16.mxu0 %v2571_v57  ;;  %2223 = vmatprep.subr.bf16.mxu1 %v2571_v57  ;;  %v1220_v34 = vld [vmem:[%s2980_s25 + $0x8] sm:$0xff]  ;;  %v2236_v35 = vpack.c.bf16 %v1055_v32, %v1054_v30  ;;  %v1057_v38 = vld [vmem:[%s2979_s21 + $0x18] sm:$0xff]  ;;  %v1221_v40 = vld [vmem:[%s2980_s25 + $0x10] sm:$0xff]  ;;  %p463_p12 = scmp.ge.s32.totalorder %s466_s5, 8  }
 0x182   : > { %v2248_v39 = vpack.c.bf16 %v1220_v34, %v1219_v33  ;;  %v817_v61 = vld [vmem:[%s816_s11] sm:$0x3]  ;;  %s2572_s1 = smov (%p463_p12), [#allocation15]  }
 0x183   : > { %v1934_v14 = vld [vmem:[%s2985_s24] ss:$0 sm:$0xff]  ;;  %v1489_v25 = vld [vmem:[%s2986_s16 + $0x8] sm:$0xff]  ;;  %v1490_v34 = vld [vmem:[%s2986_s16 + $0x10] sm:$0xff]  ;;  %s1850_s0 = sshll.u32 (%p463_p12), %s2572_s1, 4  ;;  %s1851_s0 = int_to_ptr.vmem [resolvable:$true] %s1850_s0 }
 0x184   : > { %v1488_v23 = vld [vmem:[%s2986_s16] sm:$0xff]  ;;  %s2494_s4 = scalar_lea.vmem (%p463_p12), %s1851_s0, 64  ;;  %p2499_p0 = scmp.lt.s32.totalorder (%p463_p12), %s1851_s0, %s1851_s0 }
 0x185   : > { %v2266_v32 = vpack.c.bf16 %v1489_v25, %v1488_v23  ;;  %p2495_p13 = scmp.ne.s32.totalorder (%p463_p12), %s1851_s0, %s2494_s4  ;;  %p2500_p1 = scmp.lt.s32.totalorder (%p463_p12), %s2494_s4, %s2494_s4 }
 0x187   :  { %p2501_p2 = por (%p463_p12), %p2500_p1, %p2499_p0 }
 0x189   :  { %p2502_p3 = pnand (%p463_p12), %p2501_p2, %p2495_p13 }
 0x251   : > { %v641_v41 = vpop.f32.mrb[0].mxu1  ;;  %v566_v42 = vpop.f32.mrb[0].mxu0 }
 0x252   : > { %v2062_v43 = vpop.f32.mrb[1].mxu1  ;;  %v649_v44 = vsel %vm645_vm4, %v641_v41, -inf  ;;  %v2057_v45 = vpop.f32.mrb[1].mxu0  ;;  %v646_v46 = vsel %vm645_vm4, %v566_v42, -inf }
 0x253   : > { %650 = vmax.xlane.f32.xlu0 %v649_v44  ;;  %v1323_v44 = vld [vmem:[%s2981_s14] sm:$0xff]  ;;  %v1324_v45 = vld [vmem:[%s2981_s14 + $0x8] sm:$0xff] }
 0x257   : > { %647 = vmax.xlane.f32.xlu0 %v646_v46  ;;  %v1407_v46 = vld [vmem:[%s2982_s30] sm:$0xff] }
 0x2e0   : > { %v651_v47 = vpop.xlane.xlu0 %650 }
 0x2e1   : > { %v653_v48 = vsub.f32 %v641_v41, %v651_v47  ;;  %v1222_v41 = vld [vmem:[%s2980_s25 + $0x18] sm:$0xff]  ;;  %v2254_v47 = vpack.c.bf16 %v1324_v45, %v1323_v44  ;;  %v1735_v44 = vld [vmem:[%s2989_s26 + $0x8] sm:$0xff] }
 0x2e2   : > { %v2251_v43 = vpack.c.bf16 %v1222_v41, %v1221_v40  ;;  %v1569_v41 = vld [vmem:[%s2988_s23] sm:$0xff] }
 0x2e3   : > { %v656_v49 = vmul.f32 1.442695, %v653_v48  ;;  %v1408_v48 = vld [vmem:[%s2982_s30 + $0x8] sm:$0xff] }
 0x2e4   : > { %v648_v50 = vpop.xlane.xlu0 %647 }
 0x2e5   : > { %2356 = vpow2.f32 %v656_v49  ;;  %v652_v51 = vsub.f32 %v566_v42, %v648_v50  ;;  %v2239_v42 = vpack.c.bf16 %v1057_v38, %v1056_v37  ;;  %v1325_v49 = vld [vmem:[%s2981_s14 + $0x10] sm:$0xff]  ;;  %v1326_v50 = vld [vmem:[%s2981_s14 + $0x18] sm:$0xff] }
 0x2e6   : > { %v1491_v37 = vld [vmem:[%s2986_s16 + $0x18] sm:$0xff]  ;;  %v1655_v38 = vld [vmem:[%s2987_s18 + $0x10] sm:$0xff] }
 0x2e7   : > { %v654_v52 = vmul.f32 1.442695, %v652_v51  ;;  %v2260_v51 = vpack.c.bf16 %v1408_v48, %v1407_v46  ;;  %v1322_v46 = vld [vmem:[#allocation2 + $0x2] sm:$0x3]  ;;  %v1572_v48 = vld [vmem:[%s2988_s23 + $0x18] sm:$0xff] }
 0x2e9   : > { %2358 = vpow2.f32 %v654_v52  ;;  %v1409_v52 = vld [vmem:[%s2982_s30 + $0x10] sm:$0xff] }
 0x2ef   : > { %v2357_v53 = vpop.eup %2356 }
 0x2f0   : > { %v661_v54 = vsel %vm645_vm4, %v2357_v53, 0.0 }
 0x2f1   : > { %662 = vadd.xlane.f32.xlu1 %v661_v54  ;;  %v2257_v54 = vpack.c.bf16 %v1326_v50, %v1325_v49  ;;  %v1736_v50 = vld [vmem:[%s2989_s26 + $0x10] sm:$0xff] }
 0x2f3   : > { %v2359_v55 = vpop.eup %2358 }
 0x2f4   : > { %v658_v56 = vsel %vm645_vm4, %v2359_v55, 0.0 }
 0x2f5   : > { %659 = vadd.xlane.f32.xlu1 %v658_v56 }
 0x37e   : > { %v663_v58 = vpop.xlane.xlu1 %662 }
 0x37f   : > { %2360 = vrcp.f32 %v663_v58 }
 0x382   : > { %v660_v59 = vpop.xlane.xlu1 %659 }
 0x383   : > { %2362 = vrcp.f32 %v660_v59 }
 0x389   : > { %v2361_v62 = vpop.eup %2360 }
 0x38a   : > { %v667_v0 = vmul.f32 %v2361_v62, %v2357_v53  ;;  %v1410_v53 = vld [vmem:[%s2982_s30 + $0x18] sm:$0xff]  ;;  %v1930_v62 = vld [vmem:[%s2983_s6] ss:$0 sm:$0xff] }
 0x38b   : > { %v2289_v1 = vadd.f32 %v1930_v62, %v817_v61  ;;  %v1940_v61 = vld [vmem:[#allocation6] ss:$0 sm:$0xff]  ;;  %v1946_v62 = vld [vmem:[#allocation12] ss:$0 sm:$0xff] }
 0x38c   : > { %2071 = vmatmul.mubr.msk.f32.vlgmr.msra.gmra.mrb[2].mxu1 %vm668_vm5, %v667_v0  ;;  %v1932_v0 = vld [vmem:[%s2984_s12] ss:$0 sm:$0xff] }
 0x38d   : > { %v2363_v3 = vpop.eup %2362  ;;  %2225 = vmatpush3.bf16.msra.mxu1 %v2224_v63  ;;  %2092 = vmatprep.mubr.msk.f32.mxu1 %vm2570_vm3, %v2568_v31  ;;  %v901_v63 = vld [vmem:[%s900_s15] sm:$0x3] }
 0x38e   : > { %v666_v5 = vmul.f32 %v2363_v3, %v2359_v55  ;;  %2226 = vmatprep.subr.bf16.mxu1 %v2571_v57  ;;  %v2263_v55 = vpack.c.bf16 %v1410_v53, %v1409_v52  ;;  %v2291_v2 = vadd.f32 %v1932_v0, %v901_v63  ;;  %v2295_v0 = vadd.f32 %v1946_v62, %v1940_v61 }
 0x390   : > { %2066 = vmatmul.mubr.msk.f32.vlgmr.msra.gmra.mrb[2].mxu0 %vm668_vm5, %v666_v5 }
 0x391   : > { %2219 = vmatpush3.bf16.msra.mxu0 %v2218_v4  ;;  %2081 = vmatprep.mubr.msk.f32.mxu0 %vm2570_vm3, %v2568_v31 }
 0x392   : > { %2220 = vmatprep.subr.bf16.mxu0 %v2571_v57  ;;  %2228 = vmatpush3.bf16.msra.mxu1 %v2227_v11 }
 0x393   : > { %2241 = vmatprep.subr.bf16.mxu1 %v2571_v57 }
 0x395   : > { %2222 = vmatpush3.bf16.msra.mxu0 %v2221_v8 }
 0x396   : > { %2229 = vmatprep.subr.bf16.mxu0 %v2571_v57 }
 0x45f   : > { %v811_v13 = vpop.f32.mrb[2].mxu1 }
 0x460   : > { %v2072_v17 = vpop.f32.mrb[3].mxu1  ;;  %v824_v18 = vrot.slane %v811_v13, 7 }
 0x461   : > { %v978_v17 = vld [vmem:[%s977_s22] sm:$0x3] }
 0x463   : > { %v738_v22 = vpop.f32.mrb[2].mxu0 }
 0x464   : > { %v826_v26 = vsel %vm825_vm6, %v824_v18, %v738_v22  ;;  %v2067_v27 = vpop.f32.mrb[3].mxu0 }
 0x465   : > { %2082 = vmatmul.mubr.msk.f32.vlgmr.msra.gmra.mrb[4].mxu0 %vm286_vm2, %v826_v26  ;;  %2093 = vmatmul.mubr.msk.f32.vlgmr.msra.gmra.mrb[4].mxu1 %vm286_vm2, %v826_v26  ;;  %v1654_v27 = vld [vmem:[%s2987_s18 + $0x8] sm:$0xff] }
 0x466   : > { %2231 = vmatpush3.bf16.msra.mxu0 %v2230_v19  ;;  %2243 = vmatpush3.bf16.msra.mxu1 %v2242_v20 }
 0x467   : > { %2232 = vmatprep.subr.bf16.mxu0 %v2571_v57  ;;  %2244 = vmatprep.subr.bf16.mxu1 %v2571_v57 }
 0x468   : > { %2103 = vmatprep.mubr.msk.f32.mxu0 %vm2570_vm3, %v2568_v31  ;;  %2125 = vmatprep.mubr.msk.f32.mxu1 %vm2570_vm3, %v2568_v31 }
 0x46a   : > { %2234 = vmatpush3.bf16.msra.mxu0 %v2233_v28  ;;  %2246 = vmatpush3.bf16.msra.mxu1 %v2245_v29 }
 0x46b   : > { %2235 = vmatprep.subr.bf16.mxu0 %v2571_v57  ;;  %2247 = vmatprep.subr.bf16.mxu1 %v2571_v57 }
 0x46d   : > { %2104 = vmatmul.mubr.msk.f32.vlgmr.msra.gmra.mrb[6].mxu0 %vm286_vm2, %v826_v26  ;;  %2126 = vmatmul.mubr.msk.f32.vlgmr.msra.gmra.mrb[4].mxu1 %vm286_vm2, %v2852_v36  ;;  %v1653_v26 = vld [vmem:[%s2987_s18] sm:$0xff] }
 0x46e   : > { %2237 = vmatpush3.bf16.msra.mxu0 %v2236_v35  ;;  %2114 = vmatprep.mubr.msk.f32.mxu0 %vm2570_vm3, %v2568_v31  ;;  %v2278_v33 = vpack.c.bf16 %v1654_v27, %v1653_v26 }
 0x46f   : > { %2238 = vmatprep.subr.bf16.mxu0 %v2571_v57  ;;  %2249 = vmatpush3.bf16.msra.mxu1 %v2248_v39  ;;  %v1656_v39 = vld [vmem:[%s2987_s18 + $0x18] sm:$0xff] }
 0x470   : > { %2250 = vmatprep.subr.bf16.mxu1 %v2571_v57  ;;  %2136 = vmatprep.mubr.msk.f32.mxu1 %vm2570_vm3, %v2568_v31  ;;  %v2281_v40 = vpack.c.bf16 %v1656_v39, %v1655_v38 }
 0x472   : > { %2240 = vmatpush3.bf16.msra.mxu0 %v2239_v42  ;;  %v1570_v42 = vld [vmem:[%s2988_s23 + $0x8] sm:$0xff] }
 0x473   : > { %2252 = vmatpush3.bf16.msra.mxu1 %v2251_v43  ;;  %2253 = vmatprep.subr.bf16.mxu0 %v2571_v57  ;;  %v1734_v43 = vld [vmem:[%s2989_s26] sm:$0xff]  ;;  %v2272_v45 = vpack.c.bf16 %v1570_v42, %v1569_v41 }
 0x474   : > { %2259 = vmatprep.subr.bf16.mxu1 %v2571_v57  ;;  %v2284_v49 = vpack.c.bf16 %v1735_v44, %v1734_v43 }
 0x475   : > { %2115 = vmatmul.mubr.msk.f32.vlgmr.msra.gmra.mrb[4].mxu0 %vm286_vm2, %v2852_v36 }
 0x476   : > { %2137 = vmatmul.mubr.msk.f32.vlgmr.msra.gmra.mrb[6].mxu1 %vm286_vm2, %v2852_v36  ;;  %2147 = vmatprep.mubr.msk.f32.mxu0 %vm2570_vm3, %v2568_v31 }
 0x477   : > { %2158 = vmatprep.mubr.msk.f32.mxu1 %vm2570_vm3, %v2568_v31  ;;  %2255 = vmatpush3.bf16.msra.mxu0 %v2254_v47  ;;  %v1571_v47 = vld [vmem:[%s2988_s23 + $0x10] sm:$0xff] }
 0x478   : > { %2261 = vmatpush3.bf16.msra.mxu1 %v2260_v51  ;;  %2256 = vmatprep.subr.bf16.mxu0 %v2571_v57  ;;  %v1737_v51 = vld [vmem:[%s2989_s26 + $0x18] sm:$0xff]  ;;  %v2275_v52 = vpack.c.bf16 %v1572_v48, %v1571_v47 }
 0x479   : > { %2262 = vmatprep.subr.bf16.mxu1 %v2571_v57  ;;  %v2287_v53 = vpack.c.bf16 %v1737_v51, %v1736_v50 }
 0x47b   : > { %2258 = vmatpush3.bf16.msra.mxu0 %v2257_v54 }
 0x47c   : > { %2264 = vmatpush3.bf16.msra.mxu1 %v2263_v55  ;;  %2265 = vmatprep.subr.bf16.mxu0 %v2571_v57 }
 0x47d   : > { %2277 = vmatprep.subr.bf16.mxu1 %v2571_v57 }
 0x540   : > { %v1049_v56 = vpop.f32.mrb[6].mxu0  ;;  %v1215_v58 = vpop.f32.mrb[4].mxu1 }
 0x541   : > { %v2105_v59 = vpop.f32.mrb[7].mxu0  ;;  %v2127_v60 = vpop.f32.mrb[5].mxu1  ;;  %v2292_v9 = vadd.f32 %v2291_v2, %v1215_v58  ;;  %v1053_v19 = vadd.f32 %v1049_v56, %v978_v17 }
 0x542   : > { %v1938_v59 = vld [vmem:[%s2990_s27] ss:$0 sm:$0xff]  ;;  %v1944_v60 = vld [vmem:[#allocation11] ss:$0 sm:$0xff] }
 0x543   : > { %v1937_v10 = vmul.f32 -1.442695, %v2292_v9  ;;  %v2293_v63 = vadd.f32 %v1944_v60, %v1938_v59 }
 0x548   : > { %v1134_v3 = vpop.f32.mrb[4].mxu0 }
 0x549   : > { %v2290_v4 = vadd.f32 %v2289_v1, %v1134_v3  ;;  %v2116_v5 = vpop.f32.mrb[5].mxu0  ;;  %v1296_v6 = vpop.f32.mrb[6].mxu1 }
 0x54a   : > { %v2138_v7 = vpop.f32.mrb[7].mxu1  ;;  %v1297_v16 = vadd.f32 %v1934_v14, %v1296_v6 }
 0x54b   : > { %v1936_v8 = vmul.f32 -1.442695, %v2290_v4 }
 0x54d   : > { %2364 = vpow2.f32 %v1936_v8 }
 0x54e   : > { %2366 = vpow2.f32 %v1937_v10  ;;  %v1948_v10 = vld [vmem:[#allocation14] ss:$0 sm:$0xff] }
 0x557   : > { %v2365_v11 = vpop.eup %2364 }
 0x558   : > { %v1304_v12 = vadd.f32 1.0, %v2365_v11  ;;  %v2367_v13 = vpop.eup %2366 }
 0x559   : > { %v1311_v15 = vadd.f32 1.0, %v2367_v13  ;;  %v1942_v13 = vld [vmem:[#allocation9] ss:$0 sm:$0xff] }
 0x55a   : > { %2368 = vrcp.f32 %v1304_v12 }
 0x55b   : > { %2370 = vrcp.f32 %v1311_v15 }
 0x564   : > { %v2369_v18 = vpop.eup %2368 }
 0x565   : > { %v1314_v20 = vmul.f32 %v2369_v18, %v1297_v16  ;;  %v2371_v22 = vpop.eup %2370 }
 0x566   : > { %v1317_v24 = vsub.f32 1.0, %v2371_v22  ;;  %v1319_v30 = vmul.f32 %v2371_v22, %v2852_v36  ;;  %v2269_v36 = vpack.c.bf16 %v1491_v37, %v1490_v34 }
 0x567   : > { %v1315_v21 = vadd.f32 %v1314_v20, %v1053_v19 }
 0x569   : > { %2372 = vtanh.f32 %v1315_v21 }
 0x573   : > { %v2373_v28 = vpop.eup %2372 }
 0x574   : > { %v1318_v29 = vmul.f32 %v2373_v28, %v1317_v24 }
 0x576   : > { %v1320_v35 = vadd.f32 %v1319_v30, %v1318_v29 }
 0x578   : > { %1321 = vst.msk [vmem:[#allocation2] sm:$0x3] %vm190_vm0, %v1320_v35  ;;  %2148 = vmatmul.mubr.msk.f32.vlgmr.msra.gmra.mrb[8].mxu0 %vm286_vm2, %v1320_v35  ;;  %2159 = vmatmul.mubr.msk.f32.vlgmr.msra.gmra.mrb[8].mxu1 %vm286_vm2, %v1320_v35 }
 0x579   : > { %2267 = vmatpush3.bf16.msra.mxu0 %v2266_v32  ;;  %2279 = vmatpush3.bf16.msra.mxu1 %v2278_v33 }
 0x57a   : > { %2268 = vmatprep.subr.bf16.mxu0 %v2571_v57  ;;  %2280 = vmatprep.subr.bf16.mxu1 %v2571_v57 }
 0x57b   : > { %2169 = vmatprep.mubr.msk.f32.mxu0 %vm2570_vm3, %v2568_v31  ;;  %2191 = vmatprep.mubr.msk.f32.mxu1 %vm2570_vm3, %v2568_v31 }
 0x57d   : > { %2270 = vmatpush3.bf16.msra.mxu0 %v2269_v36  ;;  %2282 = vmatpush3.bf16.msra.mxu1 %v2281_v40 }
 0x57e   : > { %2271 = vmatprep.subr.bf16.mxu0 %v2571_v57  ;;  %2283 = vmatprep.subr.bf16.mxu1 %v2571_v57 }
 0x57f   :  { %v1839_v24 = vld [vmem:[#allocation2] sm:$0x3] (%p463_p12) }
 0x580   : > { %2170 = vmatmul.mubr.msk.f32.vlgmr.msra.gmra.mrb[10].mxu0 %vm286_vm2, %v1320_v35  ;;  %2192 = vmatmul.mubr.msk.f32.vlgmr.msra.gmra.mrb[8].mxu1 %vm286_vm2, %v1322_v46  ;;  %1841 = vst.msk [vmem:[#allocation15] sm:$0x3] (%p463_p12), %vm190_vm0, %v1839_v24 }
 0x581   : > { %2273 = vmatpush3.bf16.msra.mxu0 %v2272_v45  ;;  %2180 = vmatprep.mubr.msk.f32.mxu0 %vm2570_vm3, %v2568_v31 }
 0x582   : > { %2274 = vmatprep.subr.bf16.mxu0 %v2571_v57  ;;  %2285 = vmatpush3.bf16.msra.mxu1 %v2284_v49 }
 0x583   : > { %2286 = vmatprep.subr.bf16.mxu1 %v2571_v57  ;;  %2202 = vmatprep.mubr.msk.f32.mxu1 %vm2570_vm3, %v2568_v31 }
 0x585   : > { %2276 = vmatpush3.bf16.msra.mxu0 %v2275_v52 }
 0x586   : > { %2288 = vmatpush3.bf16.msra.mxu1 %v2287_v53 }
 0x588   : > { %2181 = vmatmul.mubr.msk.f32.vlgmr.msra.gmra.mrb[8].mxu0 %vm286_vm2, %v1322_v46 }
 0x589   : > { %2203 = vmatmul.mubr.msk.f32.vlgmr.msra.gmra.mrb[10].mxu1 %vm286_vm2, %v1322_v46 }
 0x653   : > { %v1565_v54 = vpop.f32.mrb[10].mxu0  ;;  %v1730_v55 = vpop.f32.mrb[8].mxu1 }
 0x654   : > { %v2171_v56 = vpop.f32.mrb[11].mxu0  ;;  %v2193_v58 = vpop.f32.mrb[9].mxu1  ;;  %v2296_v5 = vadd.f32 %v2295_v0, %v1730_v55  ;;  %v1566_v15 = vadd.f32 %v1942_v13, %v1565_v54 }
 0x656   : > { %v1951_v6 = vmul.f32 -1.442695, %v2296_v5 }
 0x65b   : > { %v1649_v57 = vpop.f32.mrb[8].mxu0 }
 0x65c   : > { %v2294_v1 = vadd.f32 %v2293_v63, %v1649_v57  ;;  %v2182_v2 = vpop.f32.mrb[9].mxu0  ;;  %v1811_v31 = vpop.f32.mrb[10].mxu1 }
 0x65d   : > { %v2204_v3 = vpop.f32.mrb[11].mxu1  ;;  %v1812_v12 = vadd.f32 %v1948_v10, %v1811_v31 }
 0x65e   : > { %v1950_v4 = vmul.f32 -1.442695, %v2294_v1 }
 0x660   : > { %2374 = vpow2.f32 %v1950_v4 }
 0x661   : > { %2376 = vpow2.f32 %v1951_v6 }
 0x66a   : > { %v2375_v7 = vpop.eup %2374 }
 0x66b   : > { %v1819_v8 = vadd.f32 1.0, %v2375_v7  ;;  %v2377_v9 = vpop.eup %2376 }
 0x66c   : > { %v1826_v11 = vadd.f32 1.0, %v2377_v9 }
 0x66d   : > { %2378 = vrcp.f32 %v1819_v8 }
 0x66e   : > { %2380 = vrcp.f32 %v1826_v11 }
 0x677   : > { %v2379_v14 = vpop.eup %2378 }
 0x678   : > { %v1829_v16 = vmul.f32 %v2379_v14, %v1812_v12  ;;  %v2381_v18 = vpop.eup %2380 }
 0x679   : > { %v1832_v19 = vsub.f32 1.0, %v2381_v18  ;;  %v1834_v21 = vmul.f32 %v2381_v18, %v1322_v46 }
 0x67a   : > { %v1830_v17 = vadd.f32 %v1829_v16, %v1566_v15 }
 0x67c   : > { %2382 = vtanh.f32 %v1830_v17 }
 0x685   :  { %465 = sbr.rel (!%p463_p12) target bundleno = 373 (0x175), region = 211 }
 0x686   : > { %v2383_v20 = vpop.eup %2382 }
 0x687   : > { %v1833_v22 = vmul.f32 %v2383_v20, %v1832_v19 }
 0x689   : > { %v1835_v23 = vadd.f32 %v1834_v21, %v1833_v22 }
 0x68b   : > { %1836 = vst.msk [vmem:[#allocation2 + $0x2] sm:$0x3] %vm190_vm0, %v1835_v23  ;;  %1838 = vst.msk [vmem:[%s1837_s28] sm:$0x3] %vm190_vm0, %v1835_v23 }
 0x692   :  { %v1840_v25 = vld [vmem:[#allocation2 + $0x2] sm:$0x3] }
 0x693   :  { %1842 = vst.msk [vmem:[#allocation15 + $0x2] sm:$0x3] %vm190_vm0, %v1840_v25 }
 0x694   :  { %2505 = shalt.err (!%p2502_p3)
}
 0x695   :  { %s2506_s2 = scalar_lea.hbm %s2738_s8, 64 }
 0x696   :  { %p2507_p4 = scmp.ne.s32.totalorder %s2738_s8, %s2506_s2  ;;  %p2510_p5 = scmp.lt.u32.totalorder %s2506_s2, %s2738_s8 }
 0x698   :  { %p2512_p6 = pnand %p2510_p5, %p2507_p4 }
 0x69a   :  { %2515 = shalt.err (!%p2512_p6)
}
 0x69b   :  { %s2573_s9 = smov 32   ;;  %s2574_s29 = smov 2  }
 0x69c   :  { %1856 = dma.vmem_to_hbm [thread:$0]  %s1851_s0, 64, %s2738_s8, [#allocation8], %s2573_s9, %s2573_s9, %s2574_s29  }
 0x69d   :  { %2526 = dma.done.wait [#allocation8], 64  }
 0x69e   :  { %2527 = vsyncadd [#allocation8], 4294967232 }
 0x69f   :  { %1862 = vsyncpa [#allocation7], 1 }
 0x6a0   :  { %1863 = vsyncpa [#allocation10], 1 }
 0x6a1   :  { %1864 = vsyncpa [#allocation13], 1 }
 0x6a2   :  { %1865 = vsyncpa [#allocation8], 1 }

</bundles_post_ra>
